<compile_context>
chip_gen: v5e
topology: v5e:2x2
jax: 0.10.0
libtpu: 0.0.40
codegen_flags: <defaults>
</compile_context>

<pallas_src>
import functools
import math

import jax
import jax.numpy as jnp
from jax.experimental import pallas as pl
from jax.experimental.pallas import tpu as pltpu

# ----------------- config (small, consistent with the module) -----------------
VOCAB = 100
MAX_SEQ_LEN = 16
NUM_LAYERS = 2
NUM_HEADS = 4
HIDDEN = 32
MLP = 64
HEAD_DIM = HIDDEN // NUM_HEADS
LN_EPS = 1e-5
NEG_INF = -1e30

# ---------------- packed weight-slab layout (one VMEM input) -------------------
# width = 3*HIDDEN (96) columns.  Per-layer block (all row offsets are
# multiples of 8 so every ref slice is sublane-aligned):
#   rows [0      , H)       : w_qkv (H, 3H)
#   rows [H      , 2H)      : [ w_o (H,H) | w_1 (H,MLP) ]
#   rows [2H     , 2H+MLP)  : w_2 (MLP, H)    in cols [0, H)
#   rows VEC_OFF + 0..7     : b_qkv, b_o, ln1_g, ln1_b, b_1, b_2, ln2_g, ln2_b
# globals: GLOBAL_OFF+0 = lnf_g, GLOBAL_OFF+1 = lnf_b
SLAB_W = 3 * HIDDEN                    # 96
VEC_OFF = 2 * HIDDEN + MLP             # 128
LAYER_ROWS = VEC_OFF + 8               # 136 (multiple of 8)
GLOBAL_OFF = NUM_LAYERS * LAYER_ROWS   # 272
SLAB_ROWS = GLOBAL_OFF + 8             # 280


# ------------------------------ fused kernel ----------------------------------
def _layer_norm(y, g, b):
    mu = jnp.mean(y, axis=-1, keepdims=True)
    var = jnp.mean(jnp.square(y - mu), axis=-1, keepdims=True)
    return (y - mu) * jax.lax.rsqrt(var + LN_EPS) * g + b


def _fused_forward_kernel(
    ids_ref,        # SMEM (B*S,) int32, s-major: ids[s*B + b]
    tok_ref,        # VMEM (V, H) token embedding table
    wslab_ref,      # VMEM (SLAB_ROWS, SLAB_W) packed weights/biases/LN params
    consts_ref,     # VMEM per-call constants: pos_rep / addmask / pool
    o_ref,          # (B, H) output
    x_scratch,      # VMEM (MN, H) scratch for the embedding gather
    *, batch, seq, mask_off, pool_off):
    B, S, H = batch, seq, HIDDEN
    MN = B * S
    scale = 1.0 / math.sqrt(HEAD_DIM)

    # ---- embedding: direct dynamic-row gather from the table (SMEM ids) ------
    for m in range(MN):                                  # MN is tiny & static
        x_scratch[pl.ds(m, 1), :] = tok_ref[pl.ds(ids_ref[m], 1), :]

    pos_rep = consts_ref[pl.ds(0, MN), :][:, :H]         # row m -> pos[m // B]
    addmask = consts_ref[pl.ds(mask_off, MN), :][:, :MN] # block-diag + key bias
    pool = consts_ref[pl.ds(pool_off, B), :][:, :MN]     # mean-pool selector

    x = x_scratch[...] + pos_rep                          # (MN, H)

    # ---- encoder layers (post-LN, relu MLP, eval-mode dropout) -- unrolled ----
    for l in range(NUM_LAYERS):
        base = l * LAYER_ROWS
        w_qkv = wslab_ref[pl.ds(base, H), :]                       # (H, 3H)
        w_ow1 = wslab_ref[pl.ds(base + H, H), :]                   # (H, 3H)
        w_o = w_ow1[:, :H]                                         # (H, H)
        w_1 = w_ow1[:, H:H + MLP]                                  # (H, MLP)
        w_2 = wslab_ref[pl.ds(base + 2 * H, MLP), :][:, :H]        # (MLP, H)
        vec = wslab_ref[pl.ds(base + VEC_OFF, 8), :]               # (8, 3H)
        b_qkv = vec[0:1, :]
        b_o, ln1_g, ln1_b = vec[1:2, :H], vec[2:3, :H], vec[3:4, :H]
        b_1 = vec[4:5, :MLP]
        b_2, ln2_g, ln2_b = vec[5:6, :H], vec[6:7, :H], vec[7:8, :H]

        qkv = jnp.dot(x, w_qkv, preferred_element_type=jnp.float32) + b_qkv
        q_all = qkv[:, :H] * scale            # scale folded once per layer
        k_t = qkv[:, H:2 * H].T               # one transpose per layer (H, MN)
        v_all = qkv[:, 2 * H:3 * H]

        heads = []
        for hd in range(NUM_HEADS):           # static head loop, no grid
            lo = hd * HEAD_DIM
            hi = lo + HEAD_DIM
            # Note: a fully-masked row yields a uniform softmax here, whereas
            # PyTorch would produce NaNs (benign behavioral difference).
            sc = jnp.dot(q_all[:, lo:hi], k_t[lo:hi, :],
                         preferred_element_type=jnp.float32) + addmask
            sc = sc - jnp.max(sc, axis=-1, keepdims=True)
            p = jnp.exp(sc)
            p = p * pl.reciprocal(jnp.sum(p, axis=-1, keepdims=True),
                                  approx=True)
            heads.append(jnp.dot(p, v_all[:, lo:hi],
                                 preferred_element_type=jnp.float32))
        attn = jnp.concatenate(heads, axis=1)                      # (MN, H)
        attn_out = jnp.dot(attn, w_o,
                           preferred_element_type=jnp.float32) + b_o
        x = _layer_norm(x + attn_out, ln1_g, ln1_b)

        h1 = jnp.dot(x, w_1, preferred_element_type=jnp.float32) + b_1
        h1 = jnp.maximum(h1, 0.0)
        h2 = jnp.dot(h1, w_2, preferred_element_type=jnp.float32) + b_2
        x = _layer_norm(x + h2, ln2_g, ln2_b)

    # ---- final LayerNorm (no residual) + AdaptiveAvgPool1d(1) over S ----------
    gl = wslab_ref[pl.ds(GLOBAL_OFF, 8), :]
    xf = _layer_norm(x, gl[0:1, :H], gl[1:2, :H])
    o_ref[...] = jnp.dot(pool, xf, preferred_element_type=jnp.float32)


# --------------------------- parameter packing --------------------------------
def pack_params(params):
    """Pack all layer weights/biases/LN params into one (SLAB_ROWS, 96) slab."""
    H, M = HIDDEN, MLP
    slab = jnp.zeros((SLAB_ROWS, SLAB_W), jnp.float32)
    for l in range(NUM_LAYERS):
        b = l * LAYER_ROWS
        slab = slab.at[b:b + H, :].set(params["w_qkv"][l])
        slab = slab.at[b + H:b + 2 * H, :H].set(params["w_o"][l])
        slab = slab.at[b + H:b + 2 * H, H:H + M].set(params["w_1"][l])
        slab = slab.at[b + 2 * H:b + 2 * H + M, :H].set(params["w_2"][l])
        v = b + VEC_OFF
        slab = slab.at[v + 0, :3 * H].set(params["b_qkv"][l, 0])
        slab = slab.at[v + 1, :H].set(params["b_o"][l, 0])
        slab = slab.at[v + 2, :H].set(params["ln1_g"][l, 0])
        slab = slab.at[v + 3, :H].set(params["ln1_b"][l, 0])
        slab = slab.at[v + 4, :M].set(params["b_1"][l, 0])
        slab = slab.at[v + 5, :H].set(params["b_2"][l, 0])
        slab = slab.at[v + 6, :H].set(params["ln2_g"][l, 0])
        slab = slab.at[v + 7, :H].set(params["ln2_b"][l, 0])
    slab = slab.at[GLOBAL_OFF, :H].set(params["lnf_g"][0])
    slab = slab.at[GLOBAL_OFF + 1, :H].set(params["lnf_b"][0])
    return {"tok_emb": params["tok_emb"].astype(jnp.float32),
            "wslab": slab,
            "pos_emb": params["pos_emb"].astype(jnp.float32)}


# --------------------------- wrapper (single call) -----------------------------
def text_transformer_forward(packed, input_ids, attention_mask=None):
    B, S = input_ids.shape
    H = HIDDEN
    assert S <= MAX_SEQ_LEN
    # TODO(synk): F.interpolate(mode='linear') resize of pos_embedding for
    # seq_len > max_seq_len is not implemented (demo uses seq_len <= max_seq_len).

    MN = B * S
    mn_pad = -(-MN // 8) * 8
    mask_off, pool_off = mn_pad, 2 * mn_pad
    cw = max(H, MN)

    # batch_first=False semantics: dim 0 (B) is the sequence, dim 1 (S) the
    # batch.  Flatten s-major so each contiguous group of B rows is one
    # independent attention problem.
    ids_flat = input_ids.astype(jnp.int32).T.reshape(MN)          # ids[s*B + b]

    pos = packed["pos_emb"][0, :S, :]                             # (S, H)
    pos_rep = jnp.repeat(pos, B, axis=0)                          # (MN, H)

    if attention_mask is not None:
        # src_key_padding_mask must be (S, B) with True => ignore that key
        # (matching the batch_first=False reinterpretation of the input).
        assert attention_mask.shape == (S, B), (
            f"attention_mask must have shape (seq, batch)={(S, B)}, "
            f"got {attention_mask.shape}")
        key_bias = jnp.where(attention_mask.astype(bool), NEG_INF, 0.0)
        key_bias = key_bias.astype(jnp.float32).reshape(MN)
    else:
        key_bias = jnp.zeros((MN,), jnp.float32)

    # Precomputed constants (tiny; DMA'd once and fully hidden behind weights).
    grp = jnp.arange(MN, dtype=jnp.int32) // B
    addmask = jnp.where(grp[:, None] == grp[None, :], key_bias[None, :], NEG_INF)
    pool = ((jnp.arange(MN, dtype=jnp.int32)[None, :] % B)
            == jnp.arange(B, dtype=jnp.int32)[:, None]).astype(jnp.float32) / S

    consts = jnp.zeros((pool_off + B, cw), jnp.float32)
    consts = consts.at[:MN, :H].set(pos_rep)
    consts = consts.at[mask_off:mask_off + MN, :MN].set(addmask)
    consts = consts.at[pool_off:pool_off + B, :MN].set(pool)

    in_arrays = [packed["tok_emb"], packed["wslab"], consts]

    def fullspec(a):
        nd = a.ndim
        return pl.BlockSpec(tuple(a.shape), lambda i, ids, nd=nd: (0,) * nd)

    kernel = functools.partial(_fused_forward_kernel, batch=B, seq=S,
                               mask_off=mask_off, pool_off=pool_off)

    return pl.pallas_call(
        kernel,
        out_shape=jax.ShapeDtypeStruct((B, H), jnp.float32),
        grid_spec=pltpu.PrefetchScalarGridSpec(
            num_scalar_prefetch=1,                 # ids go to SMEM
            grid=(1,),
            in_specs=[fullspec(a) for a in in_arrays],
            out_specs=pl.BlockSpec((B, H), lambda i, ids: (0, 0)),
            scratch_shapes=[pltpu.VMEM((MN, H), jnp.float32)],
        ),
        compiler_params=pltpu.CompilerParams(
            dimension_semantics=("arbitrary",)),
    )(ids_flat, *in_arrays)


# --------------------------- pure-JAX reference --------------------------------
def _reference_forward(params, input_ids, attention_mask=None):
    B, S = input_ids.shape
    H, MN = HIDDEN, input_ids.shape[0] * input_ids.shape[1]
    x = params["tok_emb"][input_ids] + params["pos_emb"][0, :S, :][None]
    xm = jnp.transpose(x, (1, 0, 2)).reshape(MN, H)       # row m = s*B + b
    if attention_mask is not None:
        bias = jnp.where(attention_mask.astype(bool), NEG_INF, 0.0)
        bias = bias.astype(jnp.float32).reshape(MN)
    else:
        bias = jnp.zeros((MN,), jnp.float32)
    grp = jnp.arange(MN) // B
    addmask = jnp.where(grp[:, None] == grp[None, :], bias[None, :], NEG_INF)
    scale = 1.0 / math.sqrt(HEAD_DIM)

    def ln(y, g, b):
        mu = y.mean(-1, keepdims=True)
        var = ((y - mu) ** 2).mean(-1, keepdims=True)
        return (y - mu) / jnp.sqrt(var + LN_EPS) * g + b

    for l in range(NUM_LAYERS):
        qkv = xm @ params["w_qkv"][l] + params["b_qkv"][l]
        q, k, v = qkv[:, :H] * scale, qkv[:, H:2 * H], qkv[:, 2 * H:]
        outs = []
        for hd in range(NUM_HEADS):
            lo, hi = hd * HEAD_DIM, (hd + 1) * HEAD_DIM
            p = jax.nn.softmax(q[:, lo:hi] @ k[:, lo:hi].T + addmask, axis=-1)
            outs.append(p @ v[:, lo:hi])
        attn = jnp.concatenate(outs, axis=1) @ params["w_o"][l] + params["b_o"][l]
        xm = ln(xm + attn, params["ln1_g"][l], params["ln1_b"][l])
        h = jnp.maximum(xm @ params["w_1"][l] + params["b_1"][l], 0.0)
        xm = ln(xm + h @ params["w_2"][l] + params["b_2"][l],
                params["ln2_g"][l], params["ln2_b"][l])
    xm = ln(xm, params["lnf_g"], params["lnf_b"])
    return xm.reshape(S, B, H).mean(axis=0)               # (B, H)


# --------------------------- deterministic params ------------------------------
def init_params(key):
    keys = jax.random.split(key, 1 + NUM_LAYERS)
    layer_keys = [jax.random.split(keys[1 + l], 4) for l in range(NUM_LAYERS)]

    def stack(fn):
        return jnp.stack([fn(l) for l in range(NUM_LAYERS)], axis=0)

    return {
        "tok_emb": jax.random.normal(keys[0], (VOCAB, HIDDEN), jnp.float32) * 0.02,
        "pos_emb": jnp.zeros((1, MAX_SEQ_LEN, HIDDEN), jnp.float32),  # torch.zeros init
        "w_qkv": stack(lambda l: jax.random.normal(
            layer_keys[l][0], (HIDDEN, 3 * HIDDEN), jnp.float32) * 0.05),
        "b_qkv": jnp.zeros((NUM_LAYERS, 1, 3 * HIDDEN), jnp.float32),
        "w_o": stack(lambda l: jax.random.normal(
            layer_keys[l][1], (HIDDEN, HIDDEN), jnp.float32) * 0.05),
        "b_o": jnp.zeros((NUM_LAYERS, 1, HIDDEN), jnp.float32),
        "ln1_g": jnp.ones((NUM_LAYERS, 1, HIDDEN), jnp.float32),
        "ln1_b": jnp.zeros((NUM_LAYERS, 1, HIDDEN), jnp.float32),
        "w_1": stack(lambda l: jax.random.normal(
            layer_keys[l][2], (HIDDEN, MLP), jnp.float32) * 0.05),
        "b_1": jnp.zeros((NUM_LAYERS, 1, MLP), jnp.float32),
        "w_2": stack(lambda l: jax.random.normal(
            layer_keys[l][3], (MLP, HIDDEN), jnp.float32) * 0.05),
        "b_2": jnp.zeros((NUM_LAYERS, 1, HIDDEN), jnp.float32),
        "ln2_g": jnp.ones((NUM_LAYERS, 1, HIDDEN), jnp.float32),
        "ln2_b": jnp.zeros((NUM_LAYERS, 1, HIDDEN), jnp.float32),
        "lnf_g": jnp.ones((1, HIDDEN), jnp.float32),
        "lnf_b": jnp.zeros((1, HIDDEN), jnp.float32),
    }


if __name__ == "__main__":
    key = jax.random.PRNGKey(0)
    pkey, ikey = jax.random.split(key)
    params = init_params(pkey)
    packed = pack_params(params)          # one-time weight packing

    B, S = 2, 8
    input_ids = jax.random.randint(ikey, (B, S), 0, VOCAB, dtype=jnp.int32)
    # key-padding mask in the (seq, batch) layout the encoder expects
    attn_mask = jnp.zeros((S, B), dtype=jnp.bool_).at[S - 2:, 1].set(True)

    fwd = jax.jit(text_transformer_forward)
    out = jax.block_until_ready(fwd(packed, input_ids))
    out_m = jax.block_until_ready(fwd(packed, input_ids, attn_mask))

    assert out.shape == (B, HIDDEN) and out.dtype == jnp.float32
    assert bool(jnp.all(jnp.isfinite(out))) and bool(jnp.all(jnp.isfinite(out_m)))

    ref = _reference_forward(params, input_ids, None)
    ref_m = _reference_forward(params, input_ids, attn_mask)
    assert float(jnp.max(jnp.abs(out - ref))) < 2e-2
    assert float(jnp.max(jnp.abs(out_m - ref_m))) < 2e-2

    print("KERNEL_OK")
</pallas_src>

<mosaic_0001>
module attributes {stable_mosaic.version = 11 : i64} {
  func.func @_fused_forward_kernel(%arg0: i32, %arg1: memref<16xi32, #tpu.memory_space<smem>>, %arg2: memref<100x32xf32, #tpu.memory_space<vmem>>, %arg3: memref<280x96xf32, #tpu.memory_space<vmem>>, %arg4: memref<34x32xf32, #tpu.memory_space<vmem>>, %arg5: memref<2x32xf32, #tpu.memory_space<vmem>>, %arg6: memref<16x32xf32, #tpu.memory_space<vmem>>) attributes {dimension_semantics = [#tpu.dimension_semantics<arbitrary>], iteration_bounds = array<i64: 1>, scalar_prefetch = 1 : i64, scratch_operands = 1 : i64, tpu.core_type = #tpu.core_type<tc>, window_params = [{pipeline_mode = #tpu.pipeline_mode<synchronous>, transform_indices = @transform_0, window_bounds = array<i64: 100, 32>}, {pipeline_mode = #tpu.pipeline_mode<synchronous>, transform_indices = @transform_1, window_bounds = array<i64: 280, 96>}, {pipeline_mode = #tpu.pipeline_mode<synchronous>, transform_indices = @transform_2, window_bounds = array<i64: 34, 32>}, {pipeline_mode = #tpu.pipeline_mode<synchronous>, transform_indices = @transform_3, window_bounds = array<i64: 2, 32>}]} {
    %c0 = arith.constant 0 : index
    %0 = memref.load %arg1[%c0] : memref<16xi32, #tpu.memory_space<smem>>
    %1 = arith.index_cast %0 : i32 to index
    %c0_0 = arith.constant 0 : index
    %2 = vector.load %arg2[%1, %c0_0] : memref<100x32xf32, #tpu.memory_space<vmem>>, vector<1x32xf32>
    %c0_1 = arith.constant 0 : index
    %c0_2 = arith.constant 0 : index
    %3 = vector.load %arg6[%c0_1, %c0_2] : memref<16x32xf32, #tpu.memory_space<vmem>>, vector<1x32xf32>
    tpu.vector_store %arg6[%c0_1, %c0_2], %2 {strides = array<i32>} : memref<16x32xf32, #tpu.memory_space<vmem>>, vector<1x32xf32>,
    %c1 = arith.constant 1 : index
    %4 = memref.load %arg1[%c1] : memref<16xi32, #tpu.memory_space<smem>>
    %5 = arith.index_cast %4 : i32 to index
    %c0_3 = arith.constant 0 : index
    %6 = vector.load %arg2[%5, %c0_3] : memref<100x32xf32, #tpu.memory_space<vmem>>, vector<1x32xf32>
    %c1_4 = arith.constant 1 : index
    %c0_5 = arith.constant 0 : index
    %7 = vector.load %arg6[%c1_4, %c0_5] : memref<16x32xf32, #tpu.memory_space<vmem>>, vector<1x32xf32>
    tpu.vector_store %arg6[%c1_4, %c0_5], %6 {strides = array<i32>} : memref<16x32xf32, #tpu.memory_space<vmem>>, vector<1x32xf32>,
    %c2 = arith.constant 2 : index
    %8 = memref.load %arg1[%c2] : memref<16xi32, #tpu.memory_space<smem>>
    %9 = arith.index_cast %8 : i32 to index
    %c0_6 = arith.constant 0 : index
    %10 = vector.load %arg2[%9, %c0_6] : memref<100x32xf32, #tpu.memory_space<vmem>>, vector<1x32xf32>
    %c2_7 = arith.constant 2 : index
    %c0_8 = arith.constant 0 : index
    %11 = vector.load %arg6[%c2_7, %c0_8] : memref<16x32xf32, #tpu.memory_space<vmem>>, vector<1x32xf32>
    tpu.vector_store %arg6[%c2_7, %c0_8], %10 {strides = array<i32>} : memref<16x32xf32, #tpu.memory_space<vmem>>, vector<1x32xf32>,
    %c3 = arith.constant 3 : index
    %12 = memref.load %arg1[%c3] : memref<16xi32, #tpu.memory_space<smem>>
    %13 = arith.index_cast %12 : i32 to index
    %c0_9 = arith.constant 0 : index
    %14 = vector.load %arg2[%13, %c0_9] : memref<100x32xf32, #tpu.memory_space<vmem>>, vector<1x32xf32>
    %c3_10 = arith.constant 3 : index
    %c0_11 = arith.constant 0 : index
    %15 = vector.load %arg6[%c3_10, %c0_11] : memref<16x32xf32, #tpu.memory_space<vmem>>, vector<1x32xf32>
    tpu.vector_store %arg6[%c3_10, %c0_11], %14 {strides = array<i32>} : memref<16x32xf32, #tpu.memory_space<vmem>>, vector<1x32xf32>,
    %c4 = arith.constant 4 : index
    %16 = memref.load %arg1[%c4] : memref<16xi32, #tpu.memory_space<smem>>
    %17 = arith.index_cast %16 : i32 to index
    %c0_12 = arith.constant 0 : index
    %18 = vector.load %arg2[%17, %c0_12] : memref<100x32xf32, #tpu.memory_space<vmem>>, vector<1x32xf32>
    %c4_13 = arith.constant 4 : index
    %c0_14 = arith.constant 0 : index
    %19 = vector.load %arg6[%c4_13, %c0_14] : memref<16x32xf32, #tpu.memory_space<vmem>>, vector<1x32xf32>
    tpu.vector_store %arg6[%c4_13, %c0_14], %18 {strides = array<i32>} : memref<16x32xf32, #tpu.memory_space<vmem>>, vector<1x32xf32>,
    %c5 = arith.constant 5 : index
    %20 = memref.load %arg1[%c5] : memref<16xi32, #tpu.memory_space<smem>>
    %21 = arith.index_cast %20 : i32 to index
    %c0_15 = arith.constant 0 : index
    %22 = vector.load %arg2[%21, %c0_15] : memref<100x32xf32, #tpu.memory_space<vmem>>, vector<1x32xf32>
    %c5_16 = arith.constant 5 : index
    %c0_17 = arith.constant 0 : index
    %23 = vector.load %arg6[%c5_16, %c0_17] : memref<16x32xf32, #tpu.memory_space<vmem>>, vector<1x32xf32>
    tpu.vector_store %arg6[%c5_16, %c0_17], %22 {strides = array<i32>} : memref<16x32xf32, #tpu.memory_space<vmem>>, vector<1x32xf32>,
    %c6 = arith.constant 6 : index
    %24 = memref.load %arg1[%c6] : memref<16xi32, #tpu.memory_space<smem>>
    %25 = arith.index_cast %24 : i32 to index
    %c0_18 = arith.constant 0 : index
    %26 = vector.load %arg2[%25, %c0_18] : memref<100x32xf32, #tpu.memory_space<vmem>>, vector<1x32xf32>
    %c6_19 = arith.constant 6 : index
    %c0_20 = arith.constant 0 : index
    %27 = vector.load %arg6[%c6_19, %c0_20] : memref<16x32xf32, #tpu.memory_space<vmem>>, vector<1x32xf32>
    tpu.vector_store %arg6[%c6_19, %c0_20], %26 {strides = array<i32>} : memref<16x32xf32, #tpu.memory_space<vmem>>, vector<1x32xf32>,
    %c7 = arith.constant 7 : index
    %28 = memref.load %arg1[%c7] : memref<16xi32, #tpu.memory_space<smem>>
    %29 = arith.index_cast %28 : i32 to index
    %c0_21 = arith.constant 0 : index
    %30 = vector.load %arg2[%29, %c0_21] : memref<100x32xf32, #tpu.memory_space<vmem>>, vector<1x32xf32>
    %c7_22 = arith.constant 7 : index
    %c0_23 = arith.constant 0 : index
    %31 = vector.load %arg6[%c7_22, %c0_23] : memref<16x32xf32, #tpu.memory_space<vmem>>, vector<1x32xf32>
    tpu.vector_store %arg6[%c7_22, %c0_23], %30 {strides = array<i32>} : memref<16x32xf32, #tpu.memory_space<vmem>>, vector<1x32xf32>,
    %c8 = arith.constant 8 : index
    %32 = memref.load %arg1[%c8] : memref<16xi32, #tpu.memory_space<smem>>
    %33 = arith.index_cast %32 : i32 to index
    %c0_24 = arith.constant 0 : index
    %34 = vector.load %arg2[%33, %c0_24] : memref<100x32xf32, #tpu.memory_space<vmem>>, vector<1x32xf32>
    %c8_25 = arith.constant 8 : index
    %c0_26 = arith.constant 0 : index
    %35 = vector.load %arg6[%c8_25, %c0_26] : memref<16x32xf32, #tpu.memory_space<vmem>>, vector<1x32xf32>
    tpu.vector_store %arg6[%c8_25, %c0_26], %34 {strides = array<i32>} : memref<16x32xf32, #tpu.memory_space<vmem>>, vector<1x32xf32>,
    %c9 = arith.constant 9 : index
    %36 = memref.load %arg1[%c9] : memref<16xi32, #tpu.memory_space<smem>>
    %37 = arith.index_cast %36 : i32 to index
    %c0_27 = arith.constant 0 : index
    %38 = vector.load %arg2[%37, %c0_27] : memref<100x32xf32, #tpu.memory_space<vmem>>, vector<1x32xf32>
    %c9_28 = arith.constant 9 : index
    %c0_29 = arith.constant 0 : index
    %39 = vector.load %arg6[%c9_28, %c0_29] : memref<16x32xf32, #tpu.memory_space<vmem>>, vector<1x32xf32>
    tpu.vector_store %arg6[%c9_28, %c0_29], %38 {strides = array<i32>} : memref<16x32xf32, #tpu.memory_space<vmem>>, vector<1x32xf32>,
    %c10 = arith.constant 10 : index
    %40 = memref.load %arg1[%c10] : memref<16xi32, #tpu.memory_space<smem>>
    %41 = arith.index_cast %40 : i32 to index
    %c0_30 = arith.constant 0 : index
    %42 = vector.load %arg2[%41, %c0_30] : memref<100x32xf32, #tpu.memory_space<vmem>>, vector<1x32xf32>
    %c10_31 = arith.constant 10 : index
    %c0_32 = arith.constant 0 : index
    %43 = vector.load %arg6[%c10_31, %c0_32] : memref<16x32xf32, #tpu.memory_space<vmem>>, vector<1x32xf32>
    tpu.vector_store %arg6[%c10_31, %c0_32], %42 {strides = array<i32>} : memref<16x32xf32, #tpu.memory_space<vmem>>, vector<1x32xf32>,
    %c11 = arith.constant 11 : index
    %44 = memref.load %arg1[%c11] : memref<16xi32, #tpu.memory_space<smem>>
    %45 = arith.index_cast %44 : i32 to index
    %c0_33 = arith.constant 0 : index
    %46 = vector.load %arg2[%45, %c0_33] : memref<100x32xf32, #tpu.memory_space<vmem>>, vector<1x32xf32>
    %c11_34 = arith.constant 11 : index
    %c0_35 = arith.constant 0 : index
    %47 = vector.load %arg6[%c11_34, %c0_35] : memref<16x32xf32, #tpu.memory_space<vmem>>, vector<1x32xf32>
    tpu.vector_store %arg6[%c11_34, %c0_35], %46 {strides = array<i32>} : memref<16x32xf32, #tpu.memory_space<vmem>>, vector<1x32xf32>,
    %c12 = arith.constant 12 : index
    %48 = memref.load %arg1[%c12] : memref<16xi32, #tpu.memory_space<smem>>
    %49 = arith.index_cast %48 : i32 to index
    %c0_36 = arith.constant 0 : index
    %50 = vector.load %arg2[%49, %c0_36] : memref<100x32xf32, #tpu.memory_space<vmem>>, vector<1x32xf32>
    %c12_37 = arith.constant 12 : index
    %c0_38 = arith.constant 0 : index
    %51 = vector.load %arg6[%c12_37, %c0_38] : memref<16x32xf32, #tpu.memory_space<vmem>>, vector<1x32xf32>
    tpu.vector_store %arg6[%c12_37, %c0_38], %50 {strides = array<i32>} : memref<16x32xf32, #tpu.memory_space<vmem>>, vector<1x32xf32>,
    %c13 = arith.constant 13 : index
    %52 = memref.load %arg1[%c13] : memref<16xi32, #tpu.memory_space<smem>>
    %53 = arith.index_cast %52 : i32 to index
    %c0_39 = arith.constant 0 : index
    %54 = vector.load %arg2[%53, %c0_39] : memref<100x32xf32, #tpu.memory_space<vmem>>, vector<1x32xf32>
    %c13_40 = arith.constant 13 : index
    %c0_41 = arith.constant 0 : index
    %55 = vector.load %arg6[%c13_40, %c0_41] : memref<16x32xf32, #tpu.memory_space<vmem>>, vector<1x32xf32>
    tpu.vector_store %arg6[%c13_40, %c0_41], %54 {strides = array<i32>} : memref<16x32xf32, #tpu.memory_space<vmem>>, vector<1x32xf32>,
    %c14 = arith.constant 14 : index
    %56 = memref.load %arg1[%c14] : memref<16xi32, #tpu.memory_space<smem>>
    %57 = arith.index_cast %56 : i32 to index
    %c0_42 = arith.constant 0 : index
    %58 = vector.load %arg2[%57, %c0_42] : memref<100x32xf32, #tpu.memory_space<vmem>>, vector<1x32xf32>
    %c14_43 = arith.constant 14 : index
    %c0_44 = arith.constant 0 : index
    %59 = vector.load %arg6[%c14_43, %c0_44] : memref<16x32xf32, #tpu.memory_space<vmem>>, vector<1x32xf32>
    tpu.vector_store %arg6[%c14_43, %c0_44], %58 {strides = array<i32>} : memref<16x32xf32, #tpu.memory_space<vmem>>, vector<1x32xf32>,
    %c15 = arith.constant 15 : index
    %60 = memref.load %arg1[%c15] : memref<16xi32, #tpu.memory_space<smem>>
    %61 = arith.index_cast %60 : i32 to index
    %c0_45 = arith.constant 0 : index
    %62 = vector.load %arg2[%61, %c0_45] : memref<100x32xf32, #tpu.memory_space<vmem>>, vector<1x32xf32>
    %c15_46 = arith.constant 15 : index
    %c0_47 = arith.constant 0 : index
    %63 = vector.load %arg6[%c15_46, %c0_47] : memref<16x32xf32, #tpu.memory_space<vmem>>, vector<1x32xf32>
    tpu.vector_store %arg6[%c15_46, %c0_47], %62 {strides = array<i32>} : memref<16x32xf32, #tpu.memory_space<vmem>>, vector<1x32xf32>,
    %c0_48 = arith.constant 0 : index
    %c0_49 = arith.constant 0 : index
    %64 = vector.load %arg4[%c0_48, %c0_49] : memref<34x32xf32, #tpu.memory_space<vmem>>, vector<16x32xf32>
    %c16 = arith.constant 16 : index
    %c0_50 = arith.constant 0 : index
    %65 = vector.load %arg4[%c16, %c0_50] : memref<34x32xf32, #tpu.memory_space<vmem>>, vector<16x32xf32>
    %66 = vector.extract_strided_slice %65 {offsets = [0, 0], sizes = [16, 16], strides = [1, 1]} : vector<16x32xf32> to vector<16x16xf32>
    %c32 = arith.constant 32 : index
    %c0_51 = arith.constant 0 : index
    %67 = vector.load %arg4[%c32, %c0_51] : memref<34x32xf32, #tpu.memory_space<vmem>>, vector<2x32xf32>
    %68 = vector.extract_strided_slice %67 {offsets = [0, 0], sizes = [2, 16], strides = [1, 1]} : vector<2x32xf32> to vector<2x16xf32>
    %c0_52 = arith.constant 0 : index
    %c0_53 = arith.constant 0 : index
    %69 = vector.load %arg6[%c0_52, %c0_53] : memref<16x32xf32, #tpu.memory_space<vmem>>, vector<16x32xf32>
    %70 = arith.addf %69, %64 : vector<16x32xf32>
    %c0_54 = arith.constant 0 : index
    %c0_55 = arith.constant 0 : index
    %71 = vector.load %arg3[%c0_54, %c0_55] : memref<280x96xf32, #tpu.memory_space<vmem>>, vector<32x96xf32>
    %c32_56 = arith.constant 32 : index
    %c0_57 = arith.constant 0 : index
    %72 = vector.load %arg3[%c32_56, %c0_57] : memref<280x96xf32, #tpu.memory_space<vmem>>, vector<32x96xf32>
    %73 = vector.extract_strided_slice %72 {offsets = [0, 0], sizes = [32, 32], strides = [1, 1]} : vector<32x96xf32> to vector<32x32xf32>
    %74 = vector.extract_strided_slice %72 {offsets = [0, 32], sizes = [32, 64], strides = [1, 1]} : vector<32x96xf32> to vector<32x64xf32>
    %c64 = arith.constant 64 : index
    %c0_58 = arith.constant 0 : index
    %75 = vector.load %arg3[%c64, %c0_58] : memref<280x96xf32, #tpu.memory_space<vmem>>, vector<64x96xf32>
    %76 = vector.extract_strided_slice %75 {offsets = [0, 0], sizes = [64, 32], strides = [1, 1]} : vector<64x96xf32> to vector<64x32xf32>
    %c128 = arith.constant 128 : index
    %c0_59 = arith.constant 0 : index
    %77 = vector.load %arg3[%c128, %c0_59] : memref<280x96xf32, #tpu.memory_space<vmem>>, vector<8x96xf32>
    %78 = vector.extract_strided_slice %77 {offsets = [0, 0], sizes = [1, 96], strides = [1, 1]} : vector<8x96xf32> to vector<1x96xf32>
    %79 = vector.extract_strided_slice %77 {offsets = [1, 0], sizes = [1, 32], strides = [1, 1]} : vector<8x96xf32> to vector<1x32xf32>
    %80 = vector.extract_strided_slice %77 {offsets = [2, 0], sizes = [1, 32], strides = [1, 1]} : vector<8x96xf32> to vector<1x32xf32>
    %81 = vector.extract_strided_slice %77 {offsets = [3, 0], sizes = [1, 32], strides = [1, 1]} : vector<8x96xf32> to vector<1x32xf32>
    %82 = vector.extract_strided_slice %77 {offsets = [4, 0], sizes = [1, 64], strides = [1, 1]} : vector<8x96xf32> to vector<1x64xf32>
    %83 = vector.extract_strided_slice %77 {offsets = [5, 0], sizes = [1, 32], strides = [1, 1]} : vector<8x96xf32> to vector<1x32xf32>
    %84 = vector.extract_strided_slice %77 {offsets = [6, 0], sizes = [1, 32], strides = [1, 1]} : vector<8x96xf32> to vector<1x32xf32>
    %85 = vector.extract_strided_slice %77 {offsets = [7, 0], sizes = [1, 32], strides = [1, 1]} : vector<8x96xf32> to vector<1x32xf32>
    %cst = arith.constant dense<0.000000e+00> : vector<16x96xf32>
    %86 = tpu.matmul %70, %71, %cst {dimension_numbers = #tpu.dot_dimension_numbers<[1], [0], [0], [1], [0, 0, 1, 1], [], []>} : vector<16x32xf32>, vector<32x96xf32>, vector<16x96xf32> -> vector<16x96xf32>
    %87 = vector.broadcast %78 : vector<1x96xf32> to vector<16x96xf32>
    %88 = arith.addf %86, %87 : vector<16x96xf32>
    %89 = vector.extract_strided_slice %88 {offsets = [0, 0], sizes = [16, 32], strides = [1, 1]} : vector<16x96xf32> to vector<16x32xf32>
    %cst_60 = arith.constant 0.353553385 : f32
    %90 = vector.broadcast %cst_60 : f32 to vector<16x32xf32>
    %91 = arith.mulf %89, %90 : vector<16x32xf32>
    %92 = vector.extract_strided_slice %88 {offsets = [0, 32], sizes = [16, 32], strides = [1, 1]} : vector<16x96xf32> to vector<16x32xf32>
    %93 = tpu.transpose %92, [1, 0] : vector<16x32xf32> -> vector<32x16xf32>
    %94 = vector.extract_strided_slice %88 {offsets = [0, 64], sizes = [16, 32], strides = [1, 1]} : vector<16x96xf32> to vector<16x32xf32>
    %95 = vector.extract_strided_slice %91 {offsets = [0, 0], sizes = [16, 8], strides = [1, 1]} : vector<16x32xf32> to vector<16x8xf32>
    %96 = vector.extract_strided_slice %93 {offsets = [0, 0], sizes = [8, 16], strides = [1, 1]} : vector<32x16xf32> to vector<8x16xf32>
    %cst_61 = arith.constant dense<0.000000e+00> : vector<16x16xf32>
    %97 = tpu.matmul %95, %96, %cst_61 {dimension_numbers = #tpu.dot_dimension_numbers<[1], [0], [0], [1], [0, 0, 1, 1], [], []>} : vector<16x8xf32>, vector<8x16xf32>, vector<16x16xf32> -> vector<16x16xf32>
    %98 = arith.addf %97, %66 : vector<16x16xf32>
    %cst_62 = arith.constant dense<0xFF800000> : vector<16xf32>
    %99 = vector.multi_reduction <maximumf>, %98, %cst_62 [1] : vector<16x16xf32> to vector<16xf32>
    %100 = vector.shape_cast %99 : vector<16xf32> to vector<16x1xf32>
    %101 = vector.broadcast %100 : vector<16x1xf32> to vector<16x16xf32>
    %102 = arith.subf %98, %101 : vector<16x16xf32>
    %103 = math.exp %102 : vector<16x16xf32>
    %cst_63 = arith.constant dense<0.000000e+00> : vector<16xf32>
    %104 = vector.multi_reduction <add>, %103, %cst_63 [1] : vector<16x16xf32> to vector<16xf32>
    %105 = vector.shape_cast %104 : vector<16xf32> to vector<16x1xf32>
    %106 = tpu.reciprocal %105 {approx = true} : vector<16x1xf32> -> vector<16x1xf32>
    %107 = vector.broadcast %106 : vector<16x1xf32> to vector<16x16xf32>
    %108 = arith.mulf %103, %107 : vector<16x16xf32>
    %109 = vector.extract_strided_slice %94 {offsets = [0, 0], sizes = [16, 8], strides = [1, 1]} : vector<16x32xf32> to vector<16x8xf32>
    %cst_64 = arith.constant dense<0.000000e+00> : vector<16x8xf32>
    %110 = tpu.matmul %108, %109, %cst_64 {dimension_numbers = #tpu.dot_dimension_numbers<[1], [0], [0], [1], [0, 0, 1, 1], [], []>} : vector<16x16xf32>, vector<16x8xf32>, vector<16x8xf32> -> vector<16x8xf32>
    %111 = vector.extract_strided_slice %91 {offsets = [0, 8], sizes = [16, 8], strides = [1, 1]} : vector<16x32xf32> to vector<16x8xf32>
    %112 = vector.extract_strided_slice %93 {offsets = [8, 0], sizes = [8, 16], strides = [1, 1]} : vector<32x16xf32> to vector<8x16xf32>
    %cst_65 = arith.constant dense<0.000000e+00> : vector<16x16xf32>
    %113 = tpu.matmul %111, %112, %cst_65 {dimension_numbers = #tpu.dot_dimension_numbers<[1], [0], [0], [1], [0, 0, 1, 1], [], []>} : vector<16x8xf32>, vector<8x16xf32>, vector<16x16xf32> -> vector<16x16xf32>
    %114 = arith.addf %113, %66 : vector<16x16xf32>
    %cst_66 = arith.constant dense<0xFF800000> : vector<16xf32>
    %115 = vector.multi_reduction <maximumf>, %114, %cst_66 [1] : vector<16x16xf32> to vector<16xf32>
    %116 = vector.shape_cast %115 : vector<16xf32> to vector<16x1xf32>
    %117 = vector.broadcast %116 : vector<16x1xf32> to vector<16x16xf32>
    %118 = arith.subf %114, %117 : vector<16x16xf32>
    %119 = math.exp %118 : vector<16x16xf32>
    %cst_67 = arith.constant dense<0.000000e+00> : vector<16xf32>
    %120 = vector.multi_reduction <add>, %119, %cst_67 [1] : vector<16x16xf32> to vector<16xf32>
    %121 = vector.shape_cast %120 : vector<16xf32> to vector<16x1xf32>
    %122 = tpu.reciprocal %121 {approx = true} : vector<16x1xf32> -> vector<16x1xf32>
    %123 = vector.broadcast %122 : vector<16x1xf32> to vector<16x16xf32>
    %124 = arith.mulf %119, %123 : vector<16x16xf32>
    %125 = vector.extract_strided_slice %94 {offsets = [0, 8], sizes = [16, 8], strides = [1, 1]} : vector<16x32xf32> to vector<16x8xf32>
    %cst_68 = arith.constant dense<0.000000e+00> : vector<16x8xf32>
    %126 = tpu.matmul %124, %125, %cst_68 {dimension_numbers = #tpu.dot_dimension_numbers<[1], [0], [0], [1], [0, 0, 1, 1], [], []>} : vector<16x16xf32>, vector<16x8xf32>, vector<16x8xf32> -> vector<16x8xf32>
    %127 = vector.extract_strided_slice %91 {offsets = [0, 16], sizes = [16, 8], strides = [1, 1]} : vector<16x32xf32> to vector<16x8xf32>
    %128 = vector.extract_strided_slice %93 {offsets = [16, 0], sizes = [8, 16], strides = [1, 1]} : vector<32x16xf32> to vector<8x16xf32>
    %cst_69 = arith.constant dense<0.000000e+00> : vector<16x16xf32>
    %129 = tpu.matmul %127, %128, %cst_69 {dimension_numbers = #tpu.dot_dimension_numbers<[1], [0], [0], [1], [0, 0, 1, 1], [], []>} : vector<16x8xf32>, vector<8x16xf32>, vector<16x16xf32> -> vector<16x16xf32>
    %130 = arith.addf %129, %66 : vector<16x16xf32>
    %cst_70 = arith.constant dense<0xFF800000> : vector<16xf32>
    %131 = vector.multi_reduction <maximumf>, %130, %cst_70 [1] : vector<16x16xf32> to vector<16xf32>
    %132 = vector.shape_cast %131 : vector<16xf32> to vector<16x1xf32>
    %133 = vector.broadcast %132 : vector<16x1xf32> to vector<16x16xf32>
    %134 = arith.subf %130, %133 : vector<16x16xf32>
    %135 = math.exp %134 : vector<16x16xf32>
    %cst_71 = arith.constant dense<0.000000e+00> : vector<16xf32>
    %136 = vector.multi_reduction <add>, %135, %cst_71 [1] : vector<16x16xf32> to vector<16xf32>
    %137 = vector.shape_cast %136 : vector<16xf32> to vector<16x1xf32>
    %138 = tpu.reciprocal %137 {approx = true} : vector<16x1xf32> -> vector<16x1xf32>
    %139 = vector.broadcast %138 : vector<16x1xf32> to vector<16x16xf32>
    %140 = arith.mulf %135, %139 : vector<16x16xf32>
    %141 = vector.extract_strided_slice %94 {offsets = [0, 16], sizes = [16, 8], strides = [1, 1]} : vector<16x32xf32> to vector<16x8xf32>
    %cst_72 = arith.constant dense<0.000000e+00> : vector<16x8xf32>
    %142 = tpu.matmul %140, %141, %cst_72 {dimension_numbers = #tpu.dot_dimension_numbers<[1], [0], [0], [1], [0, 0, 1, 1], [], []>} : vector<16x16xf32>, vector<16x8xf32>, vector<16x8xf32> -> vector<16x8xf32>
    %143 = vector.extract_strided_slice %91 {offsets = [0, 24], sizes = [16, 8], strides = [1, 1]} : vector<16x32xf32> to vector<16x8xf32>
    %144 = vector.extract_strided_slice %93 {offsets = [24, 0], sizes = [8, 16], strides = [1, 1]} : vector<32x16xf32> to vector<8x16xf32>
    %cst_73 = arith.constant dense<0.000000e+00> : vector<16x16xf32>
    %145 = tpu.matmul %143, %144, %cst_73 {dimension_numbers = #tpu.dot_dimension_numbers<[1], [0], [0], [1], [0, 0, 1, 1], [], []>} : vector<16x8xf32>, vector<8x16xf32>, vector<16x16xf32> -> vector<16x16xf32>
    %146 = arith.addf %145, %66 : vector<16x16xf32>
    %cst_74 = arith.constant dense<0xFF800000> : vector<16xf32>
    %147 = vector.multi_reduction <maximumf>, %146, %cst_74 [1] : vector<16x16xf32> to vector<16xf32>
    %148 = vector.shape_cast %147 : vector<16xf32> to vector<16x1xf32>
    %149 = vector.broadcast %148 : vector<16x1xf32> to vector<16x16xf32>
    %150 = arith.subf %146, %149 : vector<16x16xf32>
    %151 = math.exp %150 : vector<16x16xf32>
    %cst_75 = arith.constant dense<0.000000e+00> : vector<16xf32>
    %152 = vector.multi_reduction <add>, %151, %cst_75 [1] : vector<16x16xf32> to vector<16xf32>
    %153 = vector.shape_cast %152 : vector<16xf32> to vector<16x1xf32>
    %154 = tpu.reciprocal %153 {approx = true} : vector<16x1xf32> -> vector<16x1xf32>
    %155 = vector.broadcast %154 : vector<16x1xf32> to vector<16x16xf32>
    %156 = arith.mulf %151, %155 : vector<16x16xf32>
    %157 = vector.extract_strided_slice %94 {offsets = [0, 24], sizes = [16, 8], strides = [1, 1]} : vector<16x32xf32> to vector<16x8xf32>
    %cst_76 = arith.constant dense<0.000000e+00> : vector<16x8xf32>
    %158 = tpu.matmul %156, %157, %cst_76 {dimension_numbers = #tpu.dot_dimension_numbers<[1], [0], [0], [1], [0, 0, 1, 1], [], []>} : vector<16x16xf32>, vector<16x8xf32>, vector<16x8xf32> -> vector<16x8xf32>
    %159 = tpu.concatenate %110, %126, %142, %158 in 1 : vector<16x8xf32>, vector<16x8xf32>, vector<16x8xf32>, vector<16x8xf32> -> vector<16x32xf32>
    %cst_77 = arith.constant dense<0.000000e+00> : vector<16x32xf32>
    %160 = tpu.matmul %159, %73, %cst_77 {dimension_numbers = #tpu.dot_dimension_numbers<[1], [0], [0], [1], [0, 0, 1, 1], [], []>} : vector<16x32xf32>, vector<32x32xf32>, vector<16x32xf32> -> vector<16x32xf32>
    %161 = vector.broadcast %79 : vector<1x32xf32> to vector<16x32xf32>
    %162 = arith.addf %160, %161 : vector<16x32xf32>
    %163 = arith.addf %70, %162 : vector<16x32xf32>
    %cst_78 = arith.constant dense<0.000000e+00> : vector<16xf32>
    %164 = vector.multi_reduction <add>, %163, %cst_78 [1] : vector<16x32xf32> to vector<16xf32>
    %165 = vector.shape_cast %164 : vector<16xf32> to vector<16x1xf32>
    %cst_79 = arith.constant 3.200000e+01 : f32
    %166 = vector.broadcast %cst_79 : f32 to vector<16x1xf32>
    %167 = arith.divf %165, %166 : vector<16x1xf32>
    %168 = vector.broadcast %167 : vector<16x1xf32> to vector<16x32xf32>
    %169 = arith.subf %163, %168 : vector<16x32xf32>
    %170 = arith.mulf %169, %169 : vector<16x32xf32>
    %cst_80 = arith.constant dense<0.000000e+00> : vector<16xf32>
    %171 = vector.multi_reduction <add>, %170, %cst_80 [1] : vector<16x32xf32> to vector<16xf32>
    %172 = vector.shape_cast %171 : vector<16xf32> to vector<16x1xf32>
    %cst_81 = arith.constant 3.200000e+01 : f32
    %173 = vector.broadcast %cst_81 : f32 to vector<16x1xf32>
    %174 = arith.divf %172, %173 : vector<16x1xf32>
    %175 = vector.broadcast %167 : vector<16x1xf32> to vector<16x32xf32>
    %176 = arith.subf %163, %175 : vector<16x32xf32>
    %cst_82 = arith.constant 9.99999974E-6 : f32
    %177 = vector.broadcast %cst_82 : f32 to vector<16x1xf32>
    %178 = arith.addf %174, %177 : vector<16x1xf32>
    %179 = math.rsqrt %178 : vector<16x1xf32>
    %180 = vector.broadcast %179 : vector<16x1xf32> to vector<16x32xf32>
    %181 = arith.mulf %176, %180 : vector<16x32xf32>
    %182 = vector.broadcast %80 : vector<1x32xf32> to vector<16x32xf32>
    %183 = arith.mulf %181, %182 : vector<16x32xf32>
    %184 = vector.broadcast %81 : vector<1x32xf32> to vector<16x32xf32>
    %185 = arith.addf %183, %184 : vector<16x32xf32>
    %cst_83 = arith.constant dense<0.000000e+00> : vector<16x64xf32>
    %186 = tpu.matmul %185, %74, %cst_83 {dimension_numbers = #tpu.dot_dimension_numbers<[1], [0], [0], [1], [0, 0, 1, 1], [], []>} : vector<16x32xf32>, vector<32x64xf32>, vector<16x64xf32> -> vector<16x64xf32>
    %187 = vector.broadcast %82 : vector<1x64xf32> to vector<16x64xf32>
    %188 = arith.addf %186, %187 : vector<16x64xf32>
    %cst_84 = arith.constant 0.000000e+00 : f32
    %189 = vector.broadcast %cst_84 : f32 to vector<16x64xf32>
    %190 = arith.maximumf %188, %189 : vector<16x64xf32>
    %cst_85 = arith.constant dense<0.000000e+00> : vector<16x32xf32>
    %191 = tpu.matmul %190, %76, %cst_85 {dimension_numbers = #tpu.dot_dimension_numbers<[1], [0], [0], [1], [0, 0, 1, 1], [], []>} : vector<16x64xf32>, vector<64x32xf32>, vector<16x32xf32> -> vector<16x32xf32>
    %192 = vector.broadcast %83 : vector<1x32xf32> to vector<16x32xf32>
    %193 = arith.addf %191, %192 : vector<16x32xf32>
    %194 = arith.addf %185, %193 : vector<16x32xf32>
    %cst_86 = arith.constant dense<0.000000e+00> : vector<16xf32>
    %195 = vector.multi_reduction <add>, %194, %cst_86 [1] : vector<16x32xf32> to vector<16xf32>
    %196 = vector.shape_cast %195 : vector<16xf32> to vector<16x1xf32>
    %cst_87 = arith.constant 3.200000e+01 : f32
    %197 = vector.broadcast %cst_87 : f32 to vector<16x1xf32>
    %198 = arith.divf %196, %197 : vector<16x1xf32>
    %199 = vector.broadcast %198 : vector<16x1xf32> to vector<16x32xf32>
    %200 = arith.subf %194, %199 : vector<16x32xf32>
    %201 = arith.mulf %200, %200 : vector<16x32xf32>
    %cst_88 = arith.constant dense<0.000000e+00> : vector<16xf32>
    %202 = vector.multi_reduction <add>, %201, %cst_88 [1] : vector<16x32xf32> to vector<16xf32>
    %203 = vector.shape_cast %202 : vector<16xf32> to vector<16x1xf32>
    %cst_89 = arith.constant 3.200000e+01 : f32
    %204 = vector.broadcast %cst_89 : f32 to vector<16x1xf32>
    %205 = arith.divf %203, %204 : vector<16x1xf32>
    %206 = vector.broadcast %198 : vector<16x1xf32> to vector<16x32xf32>
    %207 = arith.subf %194, %206 : vector<16x32xf32>
    %cst_90 = arith.constant 9.99999974E-6 : f32
    %208 = vector.broadcast %cst_90 : f32 to vector<16x1xf32>
    %209 = arith.addf %205, %208 : vector<16x1xf32>
    %210 = math.rsqrt %209 : vector<16x1xf32>
    %211 = vector.broadcast %210 : vector<16x1xf32> to vector<16x32xf32>
    %212 = arith.mulf %207, %211 : vector<16x32xf32>
    %213 = vector.broadcast %84 : vector<1x32xf32> to vector<16x32xf32>
    %214 = arith.mulf %212, %213 : vector<16x32xf32>
    %215 = vector.broadcast %85 : vector<1x32xf32> to vector<16x32xf32>
    %216 = arith.addf %214, %215 : vector<16x32xf32>
    %c136 = arith.constant 136 : index
    %c0_91 = arith.constant 0 : index
    %217 = vector.load %arg3[%c136, %c0_91] : memref<280x96xf32, #tpu.memory_space<vmem>>, vector<32x96xf32>
    %c168 = arith.constant 168 : index
    %c0_92 = arith.constant 0 : index
    %218 = vector.load %arg3[%c168, %c0_92] : memref<280x96xf32, #tpu.memory_space<vmem>>, vector<32x96xf32>
    %219 = vector.extract_strided_slice %218 {offsets = [0, 0], sizes = [32, 32], strides = [1, 1]} : vector<32x96xf32> to vector<32x32xf32>
    %220 = vector.extract_strided_slice %218 {offsets = [0, 32], sizes = [32, 64], strides = [1, 1]} : vector<32x96xf32> to vector<32x64xf32>
    %c200 = arith.constant 200 : index
    %c0_93 = arith.constant 0 : index
    %221 = vector.load %arg3[%c200, %c0_93] : memref<280x96xf32, #tpu.memory_space<vmem>>, vector<64x96xf32>
    %222 = vector.extract_strided_slice %221 {offsets = [0, 0], sizes = [64, 32], strides = [1, 1]} : vector<64x96xf32> to vector<64x32xf32>
    %c264 = arith.constant 264 : index
    %c0_94 = arith.constant 0 : index
    %223 = vector.load %arg3[%c264, %c0_94] : memref<280x96xf32, #tpu.memory_space<vmem>>, vector<8x96xf32>
    %224 = vector.extract_strided_slice %223 {offsets = [0, 0], sizes = [1, 96], strides = [1, 1]} : vector<8x96xf32> to vector<1x96xf32>
    %225 = vector.extract_strided_slice %223 {offsets = [1, 0], sizes = [1, 32], strides = [1, 1]} : vector<8x96xf32> to vector<1x32xf32>
    %226 = vector.extract_strided_slice %223 {offsets = [2, 0], sizes = [1, 32], strides = [1, 1]} : vector<8x96xf32> to vector<1x32xf32>
    %227 = vector.extract_strided_slice %223 {offsets = [3, 0], sizes = [1, 32], strides = [1, 1]} : vector<8x96xf32> to vector<1x32xf32>
    %228 = vector.extract_strided_slice %223 {offsets = [4, 0], sizes = [1, 64], strides = [1, 1]} : vector<8x96xf32> to vector<1x64xf32>
    %229 = vector.extract_strided_slice %223 {offsets = [5, 0], sizes = [1, 32], strides = [1, 1]} : vector<8x96xf32> to vector<1x32xf32>
    %230 = vector.extract_strided_slice %223 {offsets = [6, 0], sizes = [1, 32], strides = [1, 1]} : vector<8x96xf32> to vector<1x32xf32>
    %231 = vector.extract_strided_slice %223 {offsets = [7, 0], sizes = [1, 32], strides = [1, 1]} : vector<8x96xf32> to vector<1x32xf32>
    %cst_95 = arith.constant dense<0.000000e+00> : vector<16x96xf32>
    %232 = tpu.matmul %216, %217, %cst_95 {dimension_numbers = #tpu.dot_dimension_numbers<[1], [0], [0], [1], [0, 0, 1, 1], [], []>} : vector<16x32xf32>, vector<32x96xf32>, vector<16x96xf32> -> vector<16x96xf32>
    %233 = vector.broadcast %224 : vector<1x96xf32> to vector<16x96xf32>
    %234 = arith.addf %232, %233 : vector<16x96xf32>
    %235 = vector.extract_strided_slice %234 {offsets = [0, 0], sizes = [16, 32], strides = [1, 1]} : vector<16x96xf32> to vector<16x32xf32>
    %cst_96 = arith.constant 0.353553385 : f32
    %236 = vector.broadcast %cst_96 : f32 to vector<16x32xf32>
    %237 = arith.mulf %235, %236 : vector<16x32xf32>
    %238 = vector.extract_strided_slice %234 {offsets = [0, 32], sizes = [16, 32], strides = [1, 1]} : vector<16x96xf32> to vector<16x32xf32>
    %239 = tpu.transpose %238, [1, 0] : vector<16x32xf32> -> vector<32x16xf32>
    %240 = vector.extract_strided_slice %234 {offsets = [0, 64], sizes = [16, 32], strides = [1, 1]} : vector<16x96xf32> to vector<16x32xf32>
    %241 = vector.extract_strided_slice %237 {offsets = [0, 0], sizes = [16, 8], strides = [1, 1]} : vector<16x32xf32> to vector<16x8xf32>
    %242 = vector.extract_strided_slice %239 {offsets = [0, 0], sizes = [8, 16], strides = [1, 1]} : vector<32x16xf32> to vector<8x16xf32>
    %cst_97 = arith.constant dense<0.000000e+00> : vector<16x16xf32>
    %243 = tpu.matmul %241, %242, %cst_97 {dimension_numbers = #tpu.dot_dimension_numbers<[1], [0], [0], [1], [0, 0, 1, 1], [], []>} : vector<16x8xf32>, vector<8x16xf32>, vector<16x16xf32> -> vector<16x16xf32>
    %244 = arith.addf %243, %66 : vector<16x16xf32>
    %cst_98 = arith.constant dense<0xFF800000> : vector<16xf32>
    %245 = vector.multi_reduction <maximumf>, %244, %cst_98 [1] : vector<16x16xf32> to vector<16xf32>
    %246 = vector.shape_cast %245 : vector<16xf32> to vector<16x1xf32>
    %247 = vector.broadcast %246 : vector<16x1xf32> to vector<16x16xf32>
    %248 = arith.subf %244, %247 : vector<16x16xf32>
    %249 = math.exp %248 : vector<16x16xf32>
    %cst_99 = arith.constant dense<0.000000e+00> : vector<16xf32>
    %250 = vector.multi_reduction <add>, %249, %cst_99 [1] : vector<16x16xf32> to vector<16xf32>
    %251 = vector.shape_cast %250 : vector<16xf32> to vector<16x1xf32>
    %252 = tpu.reciprocal %251 {approx = true} : vector<16x1xf32> -> vector<16x1xf32>
    %253 = vector.broadcast %252 : vector<16x1xf32> to vector<16x16xf32>
    %254 = arith.mulf %249, %253 : vector<16x16xf32>
    %255 = vector.extract_strided_slice %240 {offsets = [0, 0], sizes = [16, 8], strides = [1, 1]} : vector<16x32xf32> to vector<16x8xf32>
    %cst_100 = arith.constant dense<0.000000e+00> : vector<16x8xf32>
    %256 = tpu.matmul %254, %255, %cst_100 {dimension_numbers = #tpu.dot_dimension_numbers<[1], [0], [0], [1], [0, 0, 1, 1], [], []>} : vector<16x16xf32>, vector<16x8xf32>, vector<16x8xf32> -> vector<16x8xf32>
    %257 = vector.extract_strided_slice %237 {offsets = [0, 8], sizes = [16, 8], strides = [1, 1]} : vector<16x32xf32> to vector<16x8xf32>
    %258 = vector.extract_strided_slice %239 {offsets = [8, 0], sizes = [8, 16], strides = [1, 1]} : vector<32x16xf32> to vector<8x16xf32>
    %cst_101 = arith.constant dense<0.000000e+00> : vector<16x16xf32>
    %259 = tpu.matmul %257, %258, %cst_101 {dimension_numbers = #tpu.dot_dimension_numbers<[1], [0], [0], [1], [0, 0, 1, 1], [], []>} : vector<16x8xf32>, vector<8x16xf32>, vector<16x16xf32> -> vector<16x16xf32>
    %260 = arith.addf %259, %66 : vector<16x16xf32>
    %cst_102 = arith.constant dense<0xFF800000> : vector<16xf32>
    %261 = vector.multi_reduction <maximumf>, %260, %cst_102 [1] : vector<16x16xf32> to vector<16xf32>
    %262 = vector.shape_cast %261 : vector<16xf32> to vector<16x1xf32>
    %263 = vector.broadcast %262 : vector<16x1xf32> to vector<16x16xf32>
    %264 = arith.subf %260, %263 : vector<16x16xf32>
    %265 = math.exp %264 : vector<16x16xf32>
    %cst_103 = arith.constant dense<0.000000e+00> : vector<16xf32>
    %266 = vector.multi_reduction <add>, %265, %cst_103 [1] : vector<16x16xf32> to vector<16xf32>
    %267 = vector.shape_cast %266 : vector<16xf32> to vector<16x1xf32>
    %268 = tpu.reciprocal %267 {approx = true} : vector<16x1xf32> -> vector<16x1xf32>
    %269 = vector.broadcast %268 : vector<16x1xf32> to vector<16x16xf32>
    %270 = arith.mulf %265, %269 : vector<16x16xf32>
    %271 = vector.extract_strided_slice %240 {offsets = [0, 8], sizes = [16, 8], strides = [1, 1]} : vector<16x32xf32> to vector<16x8xf32>
    %cst_104 = arith.constant dense<0.000000e+00> : vector<16x8xf32>
    %272 = tpu.matmul %270, %271, %cst_104 {dimension_numbers = #tpu.dot_dimension_numbers<[1], [0], [0], [1], [0, 0, 1, 1], [], []>} : vector<16x16xf32>, vector<16x8xf32>, vector<16x8xf32> -> vector<16x8xf32>
    %273 = vector.extract_strided_slice %237 {offsets = [0, 16], sizes = [16, 8], strides = [1, 1]} : vector<16x32xf32> to vector<16x8xf32>
    %274 = vector.extract_strided_slice %239 {offsets = [16, 0], sizes = [8, 16], strides = [1, 1]} : vector<32x16xf32> to vector<8x16xf32>
    %cst_105 = arith.constant dense<0.000000e+00> : vector<16x16xf32>
    %275 = tpu.matmul %273, %274, %cst_105 {dimension_numbers = #tpu.dot_dimension_numbers<[1], [0], [0], [1], [0, 0, 1, 1], [], []>} : vector<16x8xf32>, vector<8x16xf32>, vector<16x16xf32> -> vector<16x16xf32>
    %276 = arith.addf %275, %66 : vector<16x16xf32>
    %cst_106 = arith.constant dense<0xFF800000> : vector<16xf32>
    %277 = vector.multi_reduction <maximumf>, %276, %cst_106 [1] : vector<16x16xf32> to vector<16xf32>
    %278 = vector.shape_cast %277 : vector<16xf32> to vector<16x1xf32>
    %279 = vector.broadcast %278 : vector<16x1xf32> to vector<16x16xf32>
    %280 = arith.subf %276, %279 : vector<16x16xf32>
    %281 = math.exp %280 : vector<16x16xf32>
    %cst_107 = arith.constant dense<0.000000e+00> : vector<16xf32>
    %282 = vector.multi_reduction <add>, %281, %cst_107 [1] : vector<16x16xf32> to vector<16xf32>
    %283 = vector.shape_cast %282 : vector<16xf32> to vector<16x1xf32>
    %284 = tpu.reciprocal %283 {approx = true} : vector<16x1xf32> -> vector<16x1xf32>
    %285 = vector.broadcast %284 : vector<16x1xf32> to vector<16x16xf32>
    %286 = arith.mulf %281, %285 : vector<16x16xf32>
    %287 = vector.extract_strided_slice %240 {offsets = [0, 16], sizes = [16, 8], strides = [1, 1]} : vector<16x32xf32> to vector<16x8xf32>
    %cst_108 = arith.constant dense<0.000000e+00> : vector<16x8xf32>
    %288 = tpu.matmul %286, %287, %cst_108 {dimension_numbers = #tpu.dot_dimension_numbers<[1], [0], [0], [1], [0, 0, 1, 1], [], []>} : vector<16x16xf32>, vector<16x8xf32>, vector<16x8xf32> -> vector<16x8xf32>
    %289 = vector.extract_strided_slice %237 {offsets = [0, 24], sizes = [16, 8], strides = [1, 1]} : vector<16x32xf32> to vector<16x8xf32>
    %290 = vector.extract_strided_slice %239 {offsets = [24, 0], sizes = [8, 16], strides = [1, 1]} : vector<32x16xf32> to vector<8x16xf32>
    %cst_109 = arith.constant dense<0.000000e+00> : vector<16x16xf32>
    %291 = tpu.matmul %289, %290, %cst_109 {dimension_numbers = #tpu.dot_dimension_numbers<[1], [0], [0], [1], [0, 0, 1, 1], [], []>} : vector<16x8xf32>, vector<8x16xf32>, vector<16x16xf32> -> vector<16x16xf32>
    %292 = arith.addf %291, %66 : vector<16x16xf32>
    %cst_110 = arith.constant dense<0xFF800000> : vector<16xf32>
    %293 = vector.multi_reduction <maximumf>, %292, %cst_110 [1] : vector<16x16xf32> to vector<16xf32>
    %294 = vector.shape_cast %293 : vector<16xf32> to vector<16x1xf32>
    %295 = vector.broadcast %294 : vector<16x1xf32> to vector<16x16xf32>
    %296 = arith.subf %292, %295 : vector<16x16xf32>
    %297 = math.exp %296 : vector<16x16xf32>
    %cst_111 = arith.constant dense<0.000000e+00> : vector<16xf32>
    %298 = vector.multi_reduction <add>, %297, %cst_111 [1] : vector<16x16xf32> to vector<16xf32>
    %299 = vector.shape_cast %298 : vector<16xf32> to vector<16x1xf32>
    %300 = tpu.reciprocal %299 {approx = true} : vector<16x1xf32> -> vector<16x1xf32>
    %301 = vector.broadcast %300 : vector<16x1xf32> to vector<16x16xf32>
    %302 = arith.mulf %297, %301 : vector<16x16xf32>
    %303 = vector.extract_strided_slice %240 {offsets = [0, 24], sizes = [16, 8], strides = [1, 1]} : vector<16x32xf32> to vector<16x8xf32>
    %cst_112 = arith.constant dense<0.000000e+00> : vector<16x8xf32>
    %304 = tpu.matmul %302, %303, %cst_112 {dimension_numbers = #tpu.dot_dimension_numbers<[1], [0], [0], [1], [0, 0, 1, 1], [], []>} : vector<16x16xf32>, vector<16x8xf32>, vector<16x8xf32> -> vector<16x8xf32>
    %305 = tpu.concatenate %256, %272, %288, %304 in 1 : vector<16x8xf32>, vector<16x8xf32>, vector<16x8xf32>, vector<16x8xf32> -> vector<16x32xf32>
    %cst_113 = arith.constant dense<0.000000e+00> : vector<16x32xf32>
    %306 = tpu.matmul %305, %219, %cst_113 {dimension_numbers = #tpu.dot_dimension_numbers<[1], [0], [0], [1], [0, 0, 1, 1], [], []>} : vector<16x32xf32>, vector<32x32xf32>, vector<16x32xf32> -> vector<16x32xf32>
    %307 = vector.broadcast %225 : vector<1x32xf32> to vector<16x32xf32>
    %308 = arith.addf %306, %307 : vector<16x32xf32>
    %309 = arith.addf %216, %308 : vector<16x32xf32>
    %cst_114 = arith.constant dense<0.000000e+00> : vector<16xf32>
    %310 = vector.multi_reduction <add>, %309, %cst_114 [1] : vector<16x32xf32> to vector<16xf32>
    %311 = vector.shape_cast %310 : vector<16xf32> to vector<16x1xf32>
    %cst_115 = arith.constant 3.200000e+01 : f32
    %312 = vector.broadcast %cst_115 : f32 to vector<16x1xf32>
    %313 = arith.divf %311, %312 : vector<16x1xf32>
    %314 = vector.broadcast %313 : vector<16x1xf32> to vector<16x32xf32>
    %315 = arith.subf %309, %314 : vector<16x32xf32>
    %316 = arith.mulf %315, %315 : vector<16x32xf32>
    %cst_116 = arith.constant dense<0.000000e+00> : vector<16xf32>
    %317 = vector.multi_reduction <add>, %316, %cst_116 [1] : vector<16x32xf32> to vector<16xf32>
    %318 = vector.shape_cast %317 : vector<16xf32> to vector<16x1xf32>
    %cst_117 = arith.constant 3.200000e+01 : f32
    %319 = vector.broadcast %cst_117 : f32 to vector<16x1xf32>
    %320 = arith.divf %318, %319 : vector<16x1xf32>
    %321 = vector.broadcast %313 : vector<16x1xf32> to vector<16x32xf32>
    %322 = arith.subf %309, %321 : vector<16x32xf32>
    %cst_118 = arith.constant 9.99999974E-6 : f32
    %323 = vector.broadcast %cst_118 : f32 to vector<16x1xf32>
    %324 = arith.addf %320, %323 : vector<16x1xf32>
    %325 = math.rsqrt %324 : vector<16x1xf32>
    %326 = vector.broadcast %325 : vector<16x1xf32> to vector<16x32xf32>
    %327 = arith.mulf %322, %326 : vector<16x32xf32>
    %328 = vector.broadcast %226 : vector<1x32xf32> to vector<16x32xf32>
    %329 = arith.mulf %327, %328 : vector<16x32xf32>
    %330 = vector.broadcast %227 : vector<1x32xf32> to vector<16x32xf32>
    %331 = arith.addf %329, %330 : vector<16x32xf32>
    %cst_119 = arith.constant dense<0.000000e+00> : vector<16x64xf32>
    %332 = tpu.matmul %331, %220, %cst_119 {dimension_numbers = #tpu.dot_dimension_numbers<[1], [0], [0], [1], [0, 0, 1, 1], [], []>} : vector<16x32xf32>, vector<32x64xf32>, vector<16x64xf32> -> vector<16x64xf32>
    %333 = vector.broadcast %228 : vector<1x64xf32> to vector<16x64xf32>
    %334 = arith.addf %332, %333 : vector<16x64xf32>
    %cst_120 = arith.constant 0.000000e+00 : f32
    %335 = vector.broadcast %cst_120 : f32 to vector<16x64xf32>
    %336 = arith.maximumf %334, %335 : vector<16x64xf32>
    %cst_121 = arith.constant dense<0.000000e+00> : vector<16x32xf32>
    %337 = tpu.matmul %336, %222, %cst_121 {dimension_numbers = #tpu.dot_dimension_numbers<[1], [0], [0], [1], [0, 0, 1, 1], [], []>} : vector<16x64xf32>, vector<64x32xf32>, vector<16x32xf32> -> vector<16x32xf32>
    %338 = vector.broadcast %229 : vector<1x32xf32> to vector<16x32xf32>
    %339 = arith.addf %337, %338 : vector<16x32xf32>
    %340 = arith.addf %331, %339 : vector<16x32xf32>
    %cst_122 = arith.constant dense<0.000000e+00> : vector<16xf32>
    %341 = vector.multi_reduction <add>, %340, %cst_122 [1] : vector<16x32xf32> to vector<16xf32>
    %342 = vector.shape_cast %341 : vector<16xf32> to vector<16x1xf32>
    %cst_123 = arith.constant 3.200000e+01 : f32
    %343 = vector.broadcast %cst_123 : f32 to vector<16x1xf32>
    %344 = arith.divf %342, %343 : vector<16x1xf32>
    %345 = vector.broadcast %344 : vector<16x1xf32> to vector<16x32xf32>
    %346 = arith.subf %340, %345 : vector<16x32xf32>
    %347 = arith.mulf %346, %346 : vector<16x32xf32>
    %cst_124 = arith.constant dense<0.000000e+00> : vector<16xf32>
    %348 = vector.multi_reduction <add>, %347, %cst_124 [1] : vector<16x32xf32> to vector<16xf32>
    %349 = vector.shape_cast %348 : vector<16xf32> to vector<16x1xf32>
    %cst_125 = arith.constant 3.200000e+01 : f32
    %350 = vector.broadcast %cst_125 : f32 to vector<16x1xf32>
    %351 = arith.divf %349, %350 : vector<16x1xf32>
    %352 = vector.broadcast %344 : vector<16x1xf32> to vector<16x32xf32>
    %353 = arith.subf %340, %352 : vector<16x32xf32>
    %cst_126 = arith.constant 9.99999974E-6 : f32
    %354 = vector.broadcast %cst_126 : f32 to vector<16x1xf32>
    %355 = arith.addf %351, %354 : vector<16x1xf32>
    %356 = math.rsqrt %355 : vector<16x1xf32>
    %357 = vector.broadcast %356 : vector<16x1xf32> to vector<16x32xf32>
    %358 = arith.mulf %353, %357 : vector<16x32xf32>
    %359 = vector.broadcast %230 : vector<1x32xf32> to vector<16x32xf32>
    %360 = arith.mulf %358, %359 : vector<16x32xf32>
    %361 = vector.broadcast %231 : vector<1x32xf32> to vector<16x32xf32>
    %362 = arith.addf %360, %361 : vector<16x32xf32>
    %c272 = arith.constant 272 : index
    %c0_127 = arith.constant 0 : index
    %363 = vector.load %arg3[%c272, %c0_127] : memref<280x96xf32, #tpu.memory_space<vmem>>, vector<8x96xf32>
    %364 = vector.extract_strided_slice %363 {offsets = [0, 0], sizes = [1, 32], strides = [1, 1]} : vector<8x96xf32> to vector<1x32xf32>
    %365 = vector.extract_strided_slice %363 {offsets = [1, 0], sizes = [1, 32], strides = [1, 1]} : vector<8x96xf32> to vector<1x32xf32>
    %cst_128 = arith.constant dense<0.000000e+00> : vector<16xf32>
    %366 = vector.multi_reduction <add>, %362, %cst_128 [1] : vector<16x32xf32> to vector<16xf32>
    %367 = vector.shape_cast %366 : vector<16xf32> to vector<16x1xf32>
    %cst_129 = arith.constant 3.200000e+01 : f32
    %368 = vector.broadcast %cst_129 : f32 to vector<16x1xf32>
    %369 = arith.divf %367, %368 : vector<16x1xf32>
    %370 = vector.broadcast %369 : vector<16x1xf32> to vector<16x32xf32>
    %371 = arith.subf %362, %370 : vector<16x32xf32>
    %372 = arith.mulf %371, %371 : vector<16x32xf32>
    %cst_130 = arith.constant dense<0.000000e+00> : vector<16xf32>
    %373 = vector.multi_reduction <add>, %372, %cst_130 [1] : vector<16x32xf32> to vector<16xf32>
    %374 = vector.shape_cast %373 : vector<16xf32> to vector<16x1xf32>
    %cst_131 = arith.constant 3.200000e+01 : f32
    %375 = vector.broadcast %cst_131 : f32 to vector<16x1xf32>
    %376 = arith.divf %374, %375 : vector<16x1xf32>
    %377 = vector.broadcast %369 : vector<16x1xf32> to vector<16x32xf32>
    %378 = arith.subf %362, %377 : vector<16x32xf32>
    %cst_132 = arith.constant 9.99999974E-6 : f32
    %379 = vector.broadcast %cst_132 : f32 to vector<16x1xf32>
    %380 = arith.addf %376, %379 : vector<16x1xf32>
    %381 = math.rsqrt %380 : vector<16x1xf32>
    %382 = vector.broadcast %381 : vector<16x1xf32> to vector<16x32xf32>
    %383 = arith.mulf %378, %382 : vector<16x32xf32>
    %384 = vector.broadcast %364 : vector<1x32xf32> to vector<16x32xf32>
    %385 = arith.mulf %383, %384 : vector<16x32xf32>
    %386 = vector.broadcast %365 : vector<1x32xf32> to vector<16x32xf32>
    %387 = arith.addf %385, %386 : vector<16x32xf32>
    %cst_133 = arith.constant dense<0.000000e+00> : vector<2x32xf32>
    %388 = tpu.matmul %68, %387, %cst_133 {dimension_numbers = #tpu.dot_dimension_numbers<[1], [0], [0], [1], [0, 0, 1, 1], [], []>} : vector<2x16xf32>, vector<16x32xf32>, vector<2x32xf32> -> vector<2x32xf32>
    %c0_134 = arith.constant 0 : index
    %c0_135 = arith.constant 0 : index
    %389 = vector.load %arg5[%c0_134, %c0_135] : memref<2x32xf32, #tpu.memory_space<vmem>>, vector<2x32xf32>
    tpu.vector_store %arg5[%c0_134, %c0_135], %388 {strides = array<i32>} : memref<2x32xf32, #tpu.memory_space<vmem>>, vector<2x32xf32>,
    return
  }
  func.func @transform_0(%arg0: i32, %arg1: memref<16xi32, #tpu.memory_space<smem>>) -> (i32, i32) {
    %c0_i32 = arith.constant 0 : i32
    %c0_i32_0 = arith.constant 0 : i32
    %c0_i32_1 = arith.constant 0 : i32
    return %c0_i32, %c0_i32_0 : i32, i32
  }
  func.func @transform_1(%arg0: i32, %arg1: memref<16xi32, #tpu.memory_space<smem>>) -> (i32, i32) {
    %c0_i32 = arith.constant 0 : i32
    %c0_i32_0 = arith.constant 0 : i32
    %c0_i32_1 = arith.constant 0 : i32
    return %c0_i32, %c0_i32_0 : i32, i32
  }
  func.func @transform_2(%arg0: i32, %arg1: memref<16xi32, #tpu.memory_space<smem>>) -> (i32, i32) {
    %c0_i32 = arith.constant 0 : i32
    %c0_i32_0 = arith.constant 0 : i32
    %c0_i32_1 = arith.constant 0 : i32
    return %c0_i32, %c0_i32_0 : i32, i32
  }
  func.func @transform_3(%arg0: i32, %arg1: memref<16xi32, #tpu.memory_space<smem>>) -> (i32, i32) {
    %c0_i32 = arith.constant 0 : i32
    %c0_i32_0 = arith.constant 0 : i32
    %c0_i32_1 = arith.constant 0 : i32
    return %c0_i32, %c0_i32_0 : i32, i32
  }
}

</mosaic_0001>

<bundles_post_ra>
// kernel: text_transformer_forward.1
= control target key start
LH: loop header
LB: loop body
LE: loop exit
PB: predicated region body
PF: predicated region fallthrough
CT: control target
= control target key end

     0   :  { %s1896_s18 = smov [#allocation4]   ;;  %s2344_s0 = inlined_call_operand.vmem [shape: s32[16], index: 0, kind: input, shape index: {}]   ;;  %s2345_s1 = inlined_call_operand.vmem [shape: f32[100,32], index: 1, kind: input, shape index: {}]   ;;  %s2346_s2 = inlined_call_operand.hbm [shape: f32[280,96], index: 2, kind: input, shape index: {}]   ;;  %s2347_s3 = inlined_call_operand.vmem [shape: f32[34,32], index: 3, kind: input, shape index: {}]   ;;  %s2348_s4 = inlined_call_operand.hbm [shape: f32[2,32], index: 4, kind: output, shape index: {}]  }
   0x1   :  { %s10_s17 = sshll.u32 %s2344_s0, 4  ;;  %s11_s17 = int_to_ptr.vmem [resolvable:$true] %s10_s17 }
   0x2   :  { %13 = dma.vmem_to_smem %s11_s17, 16, %s1896_s18, [#allocation3] }
   0x3   :  { %1890 = dma.done.wait [#allocation3], 16 }
   0x4   :  { %1891 = vsyncadd [#allocation3], 4294967280 }
   0x5   :  { %16 = sfence }
   0x6   :  { %17 = vsyncpa [#allocation6], 0 }
   0x7   :  { %18 = vsyncpa [#allocation7], 0  ;;  %s25_s21 = sshll.u32 %s2346_s2, 4  ;;  %s1897_s22 = smov [#allocation5]   ;;  %s26_s21 = int_to_ptr.hbm [resolvable:$true] %s25_s21 }
   0x8   :  { %s27_s23 = sshll.u32 %s1897_s22, 4  ;;  %s1898_s24 = smov 128   ;;  %s28_s23 = int_to_ptr.vmem [resolvable:$true] %s27_s23 }
   0x9   :  { %s1899_s25 = smov 8  }
   0xa   :  { %33 = dma.hbm_to_vmem [thread:$0]  %s26_s21, 4480, %s28_s23, [#allocation6], %s1898_s24, %s1898_s24, %s1899_s25  }
   0xb   :  { %1892 = dma.done.wait [#allocation6], 4480  }
   0xc   :  { %1893 = vsyncadd [#allocation6], 4294962816  ;;  %s40_s0 = sld [smem:[#allocation4]]  ;;  %vm43_vm0 = vcmask 253952   ;;  %v117_v0 = vld [vmem:[#allocation5 + $0x18] sm:$0xff]  ;;  %v116_v1 = vld [vmem:[#allocation5 + $0x10] sm:$0xff] }
   0xd   :  { %s1585_s26 = sld [smem:[#allocation4 + $0x1]]  ;;  %151 = vmatpush.msra.mxu0 %v117_v0  ;;  %v115_v2 = vld [vmem:[#allocation5 + $0x8] sm:$0xff]  ;;  %v114_v4 = vld [vmem:[#allocation5] sm:$0xff]  ;;  %v105_v17 = vld [vmem:[%s2347_s3] sm:$0xff]  ;;  %vm132_vm1 = vcmask 261120   ;;  %s1903_s16 = smov 104  }
   0xe   :  { %s1586_s27 = sld [smem:[#allocation4 + $0x2]]  ;;  %v106_v23 = vld [vmem:[%s2347_s3 + $0x8] sm:$0xff]  ;;  %v2037_v26 = vld [vmem:[#allocation5 + $0x80] sm:$0xff]  ;;  %vm170_vm2 = vcmask 64512   ;;  %vm204_vm3 = vcmask 130048   ;;  %v2086_v61 = vld [vmem:[%s2347_s3 + $0x18] sm:$0xff] }
   0xf   :  { %s1587_s28 = sld [smem:[#allocation4 + $0x3]]  ;;  %152 = vmatpush.msra.mxu0 %v116_v1  ;;  %v131_v27 = vperm.slane %v2037_v26, 0  ;;  %v2075_v49 = vld [vmem:[%s2347_s3 + $0x10] sm:$0xff]  ;;  %s1912_s2 = smov 16   ;;  %vm578_vm4 = vcmask 195584   ;;  %vm719_vm12 = vcmask 523264  }
  0x10   :  { %s1588_s29 = sld [smem:[#allocation4 + $0x4]] }
  0x11   :  { %s1947_s30 = sld [smem:[#allocation4 + $0x5]]  ;;  %153 = vmatpush.msra.mxu0 %v115_v2 }
  0x12   :  { %s41_s6 = scalar_lea.vmem %s2345_s1, %s40_s0  ;;  %s1952_s7 = sld [smem:[#allocation4 + $0x6]] }
  0x13   :  { %v42_v3 = vld [vmem:[%s41_s6] sm:$0x1]  ;;  %s46_s10 = scalar_lea.vmem %s2345_s1, %s1585_s26  ;;  %s1957_s11 = sld [smem:[#allocation4 + $0x7]]  ;;  %154 = vmatpush.msra.mxu0 %v114_v4 }
  0x14   :  { %44 = vst.msk [vmem:[#allocation2] sm:$0x1] %vm43_vm0, %v42_v3  ;;  %v47_v5 = vld [vmem:[%s46_s10] sm:$0x1]  ;;  %s50_s14 = scalar_lea.vmem %s2345_s1, %s1586_s27  ;;  %s1963_s15 = sld [smem:[#allocation4 + $0x8]] }
  0x15   :  { %48 = vst.msk [vmem:[#allocation2 + $0x1] sm:$0x1] %vm43_vm0, %v47_v5  ;;  %v51_v6 = vld [vmem:[%s50_s14] sm:$0x1]  ;;  %s54_s18 = scalar_lea.vmem %s2345_s1, %s1587_s28  ;;  %s1593_s19 = sld [smem:[#allocation4 + $0x9]] }
  0x16   :  { %52 = vst.msk [vmem:[#allocation2 + $0x2] sm:$0x1] %vm43_vm0, %v51_v6  ;;  %v55_v7 = vld [vmem:[%s54_s18] sm:$0x1]  ;;  %s58_s22 = scalar_lea.vmem %s2345_s1, %s1588_s29  ;;  %s1594_s23 = sld [smem:[#allocation4 + $0xa]] }
  0x17   :  { %56 = vst.msk [vmem:[#allocation2 + $0x3] sm:$0x1] %vm43_vm0, %v55_v7  ;;  %v59_v8 = vld [vmem:[%s58_s22] sm:$0x1]  ;;  %s62_s26 = scalar_lea.vmem %s2345_s1, %s1947_s30  ;;  %s1595_s27 = sld [smem:[#allocation4 + $0xb]] }
  0x18   :  { %60 = vst.msk [vmem:[#allocation2 + $0x4] sm:$0x1] %vm43_vm0, %v59_v8  ;;  %v63_v9 = vld [vmem:[%s62_s26] sm:$0x1]  ;;  %s66_s5 = scalar_lea.vmem %s2345_s1, %s1952_s7  ;;  %s1596_s6 = sld [smem:[#allocation4 + $0xc]] }
  0x19   :  { %64 = vst.msk [vmem:[#allocation2 + $0x5] sm:$0x1] %vm43_vm0, %v63_v9  ;;  %v67_v10 = vld [vmem:[%s66_s5] sm:$0x1]  ;;  %s70_s9 = scalar_lea.vmem %s2345_s1, %s1957_s11  ;;  %s1597_s10 = sld [smem:[#allocation4 + $0xd]] }
  0x1a   :  { %68 = vst.msk [vmem:[#allocation2 + $0x6] sm:$0x1] %vm43_vm0, %v67_v10  ;;  %v71_v11 = vld [vmem:[%s70_s9] sm:$0x1]  ;;  %s74_s13 = scalar_lea.vmem %s2345_s1, %s1963_s15  ;;  %s1598_s14 = sld [smem:[#allocation4 + $0xe]] }
  0x1b   :  { %72 = vst.msk [vmem:[#allocation2 + $0x7] sm:$0x1] %vm43_vm0, %v71_v11  ;;  %v75_v12 = vld [vmem:[%s74_s13] sm:$0x1]  ;;  %s78_s17 = scalar_lea.vmem %s2345_s1, %s1593_s19  ;;  %s1599_s18 = sld [smem:[#allocation4 + $0xf]] }
  0x1c   :  { %76 = vst.msk [vmem:[#allocation2 + $0x8] sm:$0x1] %vm43_vm0, %v75_v12  ;;  %v79_v13 = vld [vmem:[%s78_s17] sm:$0x1]  ;;  %s82_s21 = scalar_lea.vmem %s2345_s1, %s1594_s23  ;;  %s1902_s7 = smov 96  }
  0x1d   :  { %80 = vst.msk [vmem:[#allocation2 + $0x9] sm:$0x1] %vm43_vm0, %v79_v13  ;;  %v83_v14 = vld [vmem:[%s82_s21] sm:$0x1]  ;;  %s86_s24 = scalar_lea.vmem %s2345_s1, %s1595_s27  ;;  %s1904_s17 = smov 72  }
  0x1e   :  { %84 = vst.msk [vmem:[#allocation2 + $0xa] sm:$0x1] %vm43_vm0, %v83_v14  ;;  %v87_v15 = vld [vmem:[%s86_s24] sm:$0x1]  ;;  %s90_s26 = scalar_lea.vmem %s2345_s1, %s1596_s6  ;;  %s1906_s11 = smov 112  }
  0x1f   :  { %88 = vst.msk [vmem:[#allocation2 + $0xb] sm:$0x1] %vm43_vm0, %v87_v15  ;;  %v91_v16 = vld [vmem:[%s90_s26] sm:$0x1]  ;;  %s94_s23 = scalar_lea.vmem %s2345_s1, %s1597_s10  ;;  %s1907_s24 = smov 64  }
  0x20   :  { %92 = vst.msk [vmem:[#allocation2 + $0xc] sm:$0x1] %vm43_vm0, %v91_v16  ;;  %v95_v18 = vld [vmem:[%s94_s23] sm:$0x1]  ;;  %s98_s9 = scalar_lea.vmem %s2345_s1, %s1598_s14  ;;  %s1901_s14 = smov 88  }
  0x21   :  { %96 = vst.msk [vmem:[#allocation2 + $0xd] sm:$0x1] %vm43_vm0, %v95_v18  ;;  %v99_v19 = vld [vmem:[%s98_s9] sm:$0x1]  ;;  %s102_s12 = scalar_lea.vmem %s2345_s1, %s1599_s18  ;;  %s1900_s1 = smov 120  }
  0x22   :  { %v110_v20 = vld [vmem:[#allocation2] sm:$0xff]  ;;  %100 = vst.msk [vmem:[#allocation2 + $0xe] sm:$0x1] %vm43_vm0, %v99_v19  ;;  %s1905_s18 = smov 80   ;;  %s1908_s0 = smov 40  }
  0x23   :  { %v103_v21 = vld [vmem:[%s102_s12] sm:$0x1]  ;;  %v2025_v22 = vadd.f32 %v110_v20, %v105_v17  ;;  %s1909_s19 = smov 56   ;;  %s1910_s26 = smov 48  }
  0x24   :  { %104 = vst.msk [vmem:[#allocation2 + $0xf] sm:$0x1] %vm43_vm0, %v103_v21  ;;  %s1911_s28 = smov 24   ;;  %s1914_s5 = smov [#allocation8]  }
  0x25   :  { %1600 = vmatmul.msk.f32.vlgmr.msra.gmra.mxu0 %vm132_vm1, %v2025_v22  ;;  %s1557_s29 = sshll.u32 %s1914_s5, 4  ;;  %s1559_s9 = sshll.u32 %s2348_s4, 4  ;;  %s1558_s29 = int_to_ptr.vmem [resolvable:$true] %s1557_s29  ;;  %s1560_s9 = int_to_ptr.hbm [resolvable:$true] %s1559_s9 }
  0x2b   :  { %v111_v24 = vld [vmem:[#allocation2 + $0x8] sm:$0xff] }
  0x2c   :  { %v2033_v25 = vadd.f32 %v111_v24, %v106_v23 }
  0x2e   :  { %1601 = vmatmul.msk.f32.gmra.mxu0 %vm132_vm1, %v2033_v25 }
  0xa2   :  { %v156_v28 = vpop.f32.mrf.mxu0 }
  0xa3   :  { %v157_v29 = vadd.f32 %v156_v28, %v131_v27 }
  0xa5   :  { %v162_v30 = vmul.f32 0.35355338, %v157_v29 }
  0xa7   :  { %262 = vrot.lane.b32.xlu2 %v162_v30, %s1900_s1 }
  0xab   :  { %v159_v31 = vpop.f32.mrf.mxu0 }
  0xac   :  { %v160_v32 = vadd.f32 %v159_v31, %v131_v27 }
  0xae   :  { %268 = vrot.lane.b32.xlu1 %v160_v32, %s1901_s14  ;;  %168 = vrot.lane.b32.xlu0 %v160_v32, %s1902_s7  ;;  %v163_v33 = vmul.f32 0.35355338, %v160_v32  ;;  %v2043_v34 = vpack.i.bf16 %v157_v29, %v160_v32 }
  0xb0   :  { %264 = vrot.lane.b32.xlu2 %v163_v33, %s1900_s1 }
  0xb6   :  { %266 = vrot.lane.b32.xlu1 %v157_v29, %s1901_s14  ;;  %166 = vrot.lane.b32.xlu0 %v157_v29, %s1902_s7 }
  0xb8   :  { %454 = vrot.lane.b32.xlu2 %v162_v30, %s1903_s16 }
  0xbe   :  { %458 = vrot.lane.b32.xlu1 %v157_v29, %s1904_s17  ;;  %460 = vrot.lane.b32.xlu0 %v160_v32, %s1904_s17 }
  0xc0   :  { %456 = vrot.lane.b32.xlu2 %v163_v33, %s1903_s16 }
  0xc6   :  { %362 = vrot.lane.b32.xlu1 %v157_v29, %s1905_s18  ;;  %364 = vrot.lane.b32.xlu0 %v160_v32, %s1905_s18 }
  0xce   :  { %360 = vrot.lane.b32.xlu1 %v163_v33, %s1906_s11  ;;  %358 = vrot.lane.b32.xlu0 %v162_v30, %s1906_s11 }
 0x101   :  { %v263_v37 = vpop.permute.xlu2 %262 }
 0x10a   :  { %v265_v40 = vpop.permute.xlu2 %264 }
 0x112   :  { %v455_v44 = vpop.permute.xlu2 %454 }
 0x11a   :  { %v457_v47 = vpop.permute.xlu2 %456 }
 0x120   :  { %v269_v35 = vpop.permute.xlu1 %268  ;;  %v169_v36 = vpop.permute.xlu0 %168 }
 0x121   :  { %1602 = vmatpush.xpose.msk.msra.mxu1 %vm170_vm2, %v169_v36  ;;  %1608 = vmatpush.xpose.msk.msra.mxu3 %vm170_vm2, %v269_v35 }
 0x128   :  { %v267_v38 = vpop.permute.xlu1 %266  ;;  %v167_v39 = vpop.permute.xlu0 %166 }
 0x129   :  { %1603 = vmatpush.xpose.msk.msra.mxu1 %vm170_vm2, %v167_v39  ;;  %1609 = vmatpush.xpose.msk.msra.mxu3 %vm170_vm2, %v267_v38 }
 0x12c   :  { %1604 = vmatmul.msk.f32.vlgmr.msra.gmra.mxu1 %vm170_vm2, %v162_v30  ;;  %1610 = vmatmul.msk.f32.vlgmr.msra.gmra.mxu3 %vm170_vm2, %v263_v37 }
 0x130   :  { %v461_v41 = vpop.permute.xlu0 %460  ;;  %v459_v42 = vpop.permute.xlu1 %458 }
 0x131   :  { %1620 = vmatpush.xpose.msk.msrb.mxu3 %vm170_vm2, %v461_v41 }
 0x134   :  { %1605 = vmatmul.msk.f32.gmra.mxu1 %vm170_vm2, %v163_v33  ;;  %1611 = vmatmul.msk.f32.gmra.mxu3 %vm170_vm2, %v265_v40 }
 0x135   :  { %1621 = vmatpush.xpose.msk.msrb.mxu3 %vm170_vm2, %v459_v42 }
 0x138   :  { %v365_v43 = vpop.permute.xlu0 %364  ;;  %v363_v45 = vpop.permute.xlu1 %362 }
 0x139   :  { %1614 = vmatpush.xpose.msk.msrb.mxu0 %vm170_vm2, %v365_v43 }
 0x13c   :  { %1622 = vmatmul.msk.f32.vlgmr.msrb.gmra.mxu3 %vm170_vm2, %v455_v44 }
 0x13d   :  { %1615 = vmatpush.xpose.msk.msrb.mxu0 %vm170_vm2, %v363_v45 }
 0x140   :  { %v359_v46 = vpop.permute.xlu0 %358  ;;  %v361_v48 = vpop.permute.xlu1 %360 }
 0x141   :  { %1616 = vmatmul.msk.f32.vlgmr.msrb.gmra.mxu0 %vm170_vm2, %v359_v46 }
 0x144   :  { %1623 = vmatmul.msk.f32.gmra.mxu3 %vm170_vm2, %v457_v47 }
 0x149   :  { %1617 = vmatmul.msk.f32.gmra.mxu0 %vm170_vm2, %v361_v48 }
 0x1a9   :  { %v198_v50 = vpop.f32.mrf.mxu1 }
 0x1aa   :  { %v199_v51 = vadd.f32 %v198_v50, %v2075_v49 }
 0x1ac   :  { %v205_v52 = vsel %vm204_vm3, %v199_v51, -inf }
 0x1ad   :  { %206 = vmax.xlane.f32.xlu2 %v205_v52 }
 0x1af   :  { %v295_v53 = vpop.f32.mrf.mxu3 }
 0x1b0   :  { %v296_v54 = vadd.f32 %v295_v53, %v2075_v49 }
 0x1b1   :  { %v201_v62 = vpop.f32.mrf.mxu1 }
 0x1b2   :  { %v301_v55 = vsel %vm204_vm3, %v296_v54, -inf  ;;  %v202_v63 = vadd.f32 %v201_v62, %v2086_v61 }
 0x1b3   :  { %302 = vmax.xlane.f32.xlu1 %v301_v55 }
 0x1b4   :  { %v208_v4 = vsel %vm204_vm3, %v202_v63, -inf }
 0x1b7   :  { %v298_v56 = vpop.f32.mrf.mxu3 }
 0x1b8   :  { %v299_v7 = vadd.f32 %v298_v56, %v2086_v61 }
 0x1ba   :  { %v304_v8 = vsel %vm204_vm3, %v299_v7, -inf }
 0x1be   :  { %v391_v57 = vpop.f32.mrf.mxu0 }
 0x1bf   :  { %v392_v58 = vadd.f32 %v391_v57, %v2075_v49  ;;  %v487_v59 = vpop.f32.mrf.mxu3 }
 0x1c0   :  { %v488_v9 = vadd.f32 %v487_v59, %v2075_v49 }
 0x1c1   :  { %v397_v60 = vsel %vm204_vm3, %v392_v58, -inf }
 0x1c2   :  { %398 = vmax.xlane.f32.xlu0 %v397_v60  ;;  %v493_v10 = vsel %vm204_vm3, %v488_v9, -inf }
 0x1c6   :  { %v394_v0 = vpop.f32.mrf.mxu0 }
 0x1c7   :  { %v2090_v1 = vadd.f32 %v394_v0, %v2086_v61  ;;  %v490_v2 = vpop.f32.mrf.mxu3 }
 0x1c8   :  { %v2093_v3 = vadd.f32 %v490_v2, %v2086_v61 }
 0x1c9   :  { %v400_v5 = vsel %vm204_vm3, %v2090_v1, -inf }
 0x1ca   :  { %209 = vmax.xlane.f32.xlu0 %v208_v4  ;;  %401 = vmax.xlane.f32.xlu2 %v400_v5  ;;  %v496_v6 = vsel %vm204_vm3, %v2093_v3, -inf }
 0x1cb   :  { %497 = vmax.xlane.f32.xlu1 %v496_v6 }
 0x1d2   :  { %305 = vmax.xlane.f32.xlu2 %v304_v8 }
 0x1da   :  { %494 = vmax.xlane.f32.xlu2 %v493_v10 }
 0x1e4   :  { %1685 = vrot.lane.b32.xlu1 %v2043_v34, %s1907_s24 }
 0x220   :  { %v207_v11 = vpop.xlane.xlu2 %206 }
 0x221   :  { %v211_v12 = vsub.f32 %v199_v51, %v207_v11 }
 0x223   :  { %v213_v13 = vmul.f32 1.442695, %v211_v12 }
 0x225   :  { %1744 = vpow2.f32 %v213_v13 }
 0x226   :  { %v303_v14 = vpop.xlane.xlu1 %302 }
 0x227   :  { %v307_v15 = vsub.f32 %v296_v54, %v303_v14 }
 0x229   :  { %v309_v16 = vmul.f32 1.442695, %v307_v15 }
 0x22b   :  { %v1745_v17 = vpop.eup %1744  ;;  %1746 = vpow2.f32 %v309_v16 }
 0x22c   :  { %v217_v18 = vsel %vm204_vm3, %v1745_v17, 0.0 }
 0x22d   :  { %218 = vadd.xlane.f32.xlu0 %v217_v18 }
 0x231   :  { %v2107_v19 = vpop.eup %1746 }
 0x232   :  { %v313_v20 = vsel %vm204_vm3, %v2107_v19, 0.0 }
 0x235   :  { %v399_v21 = vpop.xlane.xlu0 %398  ;;  %314 = vadd.xlane.f32.xlu0 %v313_v20 }
 0x236   :  { %v403_v23 = vsub.f32 %v392_v58, %v399_v21 }
 0x238   :  { %v405_v24 = vmul.f32 1.442695, %v403_v23 }
 0x23a   :  { %1748 = vpow2.f32 %v405_v24 }
 0x23d   :  { %v210_v27 = vpop.xlane.xlu0 %209  ;;  %v402_v36 = vpop.xlane.xlu2 %401 }
 0x23e   :  { %v212_v28 = vsub.f32 %v202_v63, %v210_v27  ;;  %v498_v35 = vpop.xlane.xlu1 %497  ;;  %v404_v57 = vsub.f32 %v2090_v1, %v402_v36 }
 0x23f   :  { %v500_v50 = vsub.f32 %v2093_v3, %v498_v35 }
 0x240   :  { %v2111_v29 = vpop.eup %1748  ;;  %v215_v30 = vmul.f32 1.442695, %v212_v28  ;;  %v407_v59 = vmul.f32 1.442695, %v404_v57 }
 0x241   :  { %v409_v31 = vsel %vm204_vm3, %v2111_v29, 0.0  ;;  %v503_v52 = vmul.f32 1.442695, %v500_v50 }
 0x242   :  { %1750 = vpow2.f32 %v215_v30  ;;  %410 = vadd.xlane.f32.xlu1 %v409_v31 }
 0x245   :  { %v306_v40 = vpop.xlane.xlu2 %305 }
 0x246   :  { %v308_v41 = vsub.f32 %v299_v7, %v306_v40  ;;  %v121_v40 = vld [vmem:[#allocation5 + $0x38] sm:$0xff] }
 0x247   :  { %600 = vmatpush.msra.mxu0 %v121_v40 }
 0x248   :  { %v1751_v32 = vpop.eup %1750  ;;  %v311_v42 = vmul.f32 1.442695, %v308_v41  ;;  %v120_v41 = vld [vmem:[#allocation5 + $0x30] sm:$0xff] }
 0x249   :  { %1695 = vrot.lane.b32.xlu0 %v2043_v34, %s1908_s0  ;;  %v220_v33 = vsel %vm204_vm3, %v1751_v32, 0.0  ;;  %601 = vmatpush.msra.mxu0 %v120_v41 }
 0x24a   :  { %221 = vadd.xlane.f32.xlu2 %v220_v33  ;;  %1752 = vpow2.f32 %v311_v42  ;;  %v1704_v42 = vpack.i.bf16 %v120_v41, %v121_v40  ;;  %v126_v40 = vld [vmem:[#allocation5 + $0x60] sm:$0xff] }
 0x24d   :  { %v495_v43 = vpop.xlane.xlu2 %494 }
 0x24e   :  { %v499_v44 = vsub.f32 %v488_v9, %v495_v43  ;;  %v119_v43 = vld [vmem:[#allocation5 + $0x28] sm:$0xff] }
 0x24f   :  { %602 = vmatpush.msra.mxu0 %v119_v43 }
 0x250   :  { %v501_v45 = vmul.f32 1.442695, %v499_v44  ;;  %v1753_v46 = vpop.eup %1752  ;;  %v118_v44 = vld [vmem:[#allocation5 + $0x20] sm:$0xff] }
 0x251   :  { %v316_v47 = vsel %vm204_vm3, %v1753_v46, 0.0  ;;  %603 = vmatpush.msra.mxu0 %v118_v44 }
 0x252   :  { %1754 = vpow2.f32 %v501_v45  ;;  %v1709_v45 = vpack.i.bf16 %v118_v44, %v119_v43  ;;  %v125_v43 = vld [vmem:[#allocation5 + $0x58] sm:$0xff] }
 0x253   :  { %1756 = vpow2.f32 %v503_v52 }
 0x256   :  { %v1686_v37 = vpop.permute.xlu1 %1685 }
 0x257   :  { %v1687_v38 = vunpack.i.l.bf16 %v1686_v37  ;;  %v1688_v39 = vunpack.i.h.bf16 %v1686_v37 }
 0x258   :  { %v1755_v48 = vpop.eup %1754 }
 0x259   :  { %253 = vmatpush.msra.mxu2 %v1687_v38  ;;  %v505_v51 = vsel %vm204_vm3, %v1755_v48, 0.0  ;;  %v1757_v53 = vpop.eup %1756 }
 0x25a   :  { %v508_v54 = vsel %vm204_vm3, %v1757_v53, 0.0 }
 0x25b   :  { %254 = vmatpush.msra.mxu2 %v1688_v39 }
 0x262   :  { %1690 = vrot.lane.b32.xlu2 %v2043_v34, %s1909_s19 }
 0x273   :  { %317 = vadd.xlane.f32.xlu0 %v316_v47 }
 0x27b   :  { %506 = vadd.xlane.f32.xlu0 %v505_v51 }
 0x28b   :  { %509 = vadd.xlane.f32.xlu2 %v508_v54 }
 0x28f   :  { %1700 = vrot.lane.b32.xlu0 %v2043_v34, %s1910_s26 }
 0x2a0   :  { %v219_v55 = vpop.xlane.xlu0 %218 }
 0x2a1   :  { %1758 = vrcp.f32 %v219_v55 }
 0x2a2   :  { %1760 = vpow2.f32 %v407_v59  ;;  %v581_v59 = vperm.slane %v2037_v26, 1 }
 0x2a7   :  { %v1759_v56 = vpop.eup %1758 }
 0x2a8   :  { %v225_v58 = vmul.f32 %v1759_v56, %v1745_v17  ;;  %v1761_v60 = vpop.eup %1760  ;;  %v315_v0 = vpop.xlane.xlu0 %314 }
 0x2a9   :  { %v412_v62 = vsel %vm204_vm3, %v1761_v60, 0.0 }
 0x2aa   :  { %1606 = vmatmul.msk.f32.vlgmr.msra.gmra.mxu2 %vm204_vm3, %v225_v58 }
 0x2b5   :  { %v411_v16 = vpop.xlane.xlu1 %410 }
 0x2b9   :  { %413 = vadd.xlane.f32.xlu0 %v412_v62 }
 0x2bb   :  { %v1696_v4 = vpop.permute.xlu0 %1695 }
 0x2bc   :  { %v1697_v6 = vunpack.i.l.bf16 %v1696_v4  ;;  %v1698_v8 = vunpack.i.h.bf16 %v1696_v4 }
 0x2bd   :  { %v222_v63 = vpop.xlane.xlu2 %221 }
 0x2be   :  { %1762 = vrcp.f32 %v222_v63 }
 0x2bf   :  { %1764 = vrcp.f32 %v315_v0 }
 0x2c4   :  { %v1763_v2 = vpop.eup %1762 }
 0x2c5   :  { %v1691_v34 = vpop.permute.xlu2 %1690  ;;  %v226_v3 = vmul.f32 %v1763_v2, %v1751_v32  ;;  %v1765_v7 = vpop.eup %1764 }
 0x2c6   :  { %v1692_v5 = vunpack.i.l.bf16 %v1691_v34  ;;  %v1693_v1 = vunpack.i.h.bf16 %v1691_v34  ;;  %v321_v9 = vmul.f32 %v1765_v7, %v2107_v19 }
 0x2c7   :  { %1607 = vmatmul.msk.f32.gmra.mxu2 %vm204_vm3, %v226_v3 }
 0x2c8   :  { %349 = vmatpush.msrb.mxu2 %v1692_v5  ;;  %v1913_v5 = vmov 32.0  }
 0x2ca   :  { %350 = vmatpush.msrb.mxu2 %v1693_v1 }
 0x2cc   :  { %541 = vmatpush.msra.mxu2 %v1697_v6 }
 0x2ce   :  { %542 = vmatpush.msra.mxu2 %v1698_v8 }
 0x2cf   :  { %1612 = vmatmul.msk.f32.vlgmr.msrb.gmra.mxu2 %vm204_vm3, %v321_v9 }
 0x2e6   :  { %v318_v10 = vpop.xlane.xlu0 %317 }
 0x2e7   :  { %1766 = vrcp.f32 %v318_v10 }
 0x2ed   :  { %v1767_v11 = vpop.eup %1766 }
 0x2ee   :  { %v507_v12 = vpop.xlane.xlu0 %506  ;;  %v322_v13 = vmul.f32 %v1767_v11, %v1753_v46 }
 0x2ef   :  { %1768 = vrcp.f32 %v507_v12 }
 0x2f0   :  { %1613 = vmatmul.msk.f32.gmra.mxu2 %vm204_vm3, %v322_v13  ;;  %1770 = vrcp.f32 %v411_v16 }
 0x2f5   :  { %v1769_v14 = vpop.eup %1768 }
 0x2f6   :  { %v513_v15 = vmul.f32 %v1769_v14, %v1755_v48  ;;  %v1771_v19 = vpop.eup %1770 }
 0x2f7   :  { %v417_v24 = vmul.f32 %v1771_v19, %v2111_v29 }
 0x2f8   :  { %1624 = vmatmul.msk.f32.vlgmr.msra.gmra.mxu2 %vm204_vm3, %v513_v15 }
 0x2fe   :  { %v510_v17 = vpop.xlane.xlu2 %509 }
 0x2ff   :  { %1772 = vrcp.f32 %v510_v17 }
 0x301   :  { %v1701_v18 = vpop.permute.xlu0 %1700 }
 0x302   :  { %v1702_v20 = vunpack.i.l.bf16 %v1701_v18  ;;  %v1703_v21 = vunpack.i.h.bf16 %v1701_v18 }
 0x304   :  { %445 = vmatpush.msrb.mxu1 %v1702_v20 }
 0x305   :  { %v1773_v23 = vpop.eup %1772 }
 0x306   :  { %446 = vmatpush.msrb.mxu1 %v1703_v21  ;;  %v514_v27 = vmul.f32 %v1773_v23, %v1757_v53 }
 0x307   :  { %1618 = vmatmul.msk.f32.vlgmr.msrb.gmra.mxu1 %vm204_vm3, %v417_v24 }
 0x308   :  { %1625 = vmatmul.msk.f32.gmra.mxu2 %vm204_vm3, %v514_v27 }
 0x32c   :  { %v414_v28 = vpop.xlane.xlu0 %413 }
 0x32d   :  { %1774 = vrcp.f32 %v414_v28  ;;  %v256_v32 = vpop.f32.mrf.mxu2 }
 0x32e   :  { %1776 = vrcp.f32 %v1913_v5 }
 0x333   :  { %v1775_v30 = vpop.eup %1774 }
 0x334   :  { %v418_v31 = vmul.f32 %v1775_v30, %v1761_v60  ;;  %v1777_v1 = vpop.eup %1776 }
 0x335   :  { %v620_v6 = vmul.f32 32.0, %v1777_v1  ;;  %vm624_vm5 = vweird.f32 %v1777_v1 }
 0x336   :  { %1619 = vmatmul.msk.f32.gmra.mxu1 %vm204_vm3, %v418_v31 }
 0x337   :  { %v621_v7 = vsub.f32 1.0, %v620_v6 }
 0x339   :  { %v622_v8 = vmul.f32 %v1777_v1, %v621_v7 }
 0x33b   :  { %v623_v9 = vadd.f32 %v1777_v1, %v622_v8 }
 0x34a   :  { %v259_v33 = vpop.f32.mrf.mxu2 }
 0x352   :  { %v352_v35 = vpop.f32.mrf.mxu2 }
 0x353   :  { %552 = vrot.lane.b32.xlu1 %v352_v35, %s1899_s25 }
 0x373   :  { %v355_v36 = vpop.f32.mrf.mxu2 }
 0x37b   :  { %v544_v37 = vpop.f32.mrf.mxu2 }
 0x37c   :  { %568 = vrot.lane.b32.xlu1 %v544_v37, %s1911_s28  ;;  %v129_v37 = vld [vmem:[#allocation5 + $0x78] sm:$0xff] }
 0x37d   :  { %734 = vmatpush.msra.mxu3 %v129_v37 }
 0x384   :  { %v448_v29 = vpop.f32.mrf.mxu1  ;;  %554 = vrot.lane.b32.xlu1 %v355_v36, %s1899_s25 }
 0x385   :  { %560 = vrot.lane.b32.xlu2 %v448_v29, %s1912_s2  ;;  %v128_v29 = vld [vmem:[#allocation5 + $0x70] sm:$0xff] }
 0x386   :  { %735 = vmatpush.msra.mxu3 %v128_v29 }
 0x38b   :  { %v547_v38 = vpop.f32.mrf.mxu2 }
 0x38d   :  { %570 = vrot.lane.b32.xlu2 %v547_v38, %s1911_s28  ;;  %v127_v38 = vld [vmem:[#allocation5 + $0x68] sm:$0xff] }
 0x38e   :  { %736 = vmatpush.msra.mxu3 %v127_v38 }
 0x390   :  { %737 = vmatpush.msra.mxu3 %v126_v40 }
 0x392   :  { %738 = vmatpush.msra.mxu3 %v125_v43 }
 0x3b3   :  { %v451_v39 = vpop.f32.mrf.mxu1 }
 0x3b4   :  { %562 = vrot.lane.b32.xlu0 %v451_v39, %s1912_s2 }
 0x3c5   :  { %v553_v46 = vpop.permute.xlu1 %552 }
 0x3c6   :  { %v574_v48 = vsel %vm170_vm2, %v256_v32, %v553_v46 }
 0x3df   :  { %v561_v47 = vpop.permute.xlu2 %560 }
 0x3e0   :  { %v576_v50 = vsel %vm204_vm3, %v574_v48, %v561_v47 }
 0x3e7   :  { %v571_v56 = vpop.permute.xlu2 %570 }
 0x3ee   :  { %v569_v51 = vpop.permute.xlu1 %568 }
 0x3ef   :  { %v579_v52 = vsel %vm578_vm4, %v576_v50, %v569_v51  ;;  %v664_v50 = vperm.slane %v2037_v26, 2 }
 0x3f0   :  { %1626 = vmatmul.msk.f32.vlgmr.msra.gmra.mxu0 %vm132_vm1, %v579_v52 }
 0x3f6   :  { %v555_v53 = vpop.permute.xlu1 %554 }
 0x3f7   :  { %v575_v54 = vsel %vm170_vm2, %v259_v33, %v555_v53 }
 0x426   :  { %v563_v55 = vpop.permute.xlu0 %562 }
 0x427   :  { %v577_v57 = vsel %vm204_vm3, %v575_v54, %v563_v55  ;;  %v667_v55 = vperm.slane %v2037_v26, 3 }
 0x428   :  { %v580_v58 = vsel %vm578_vm4, %v577_v57, %v571_v56 }
 0x429   :  { %1627 = vmatmul.msk.f32.gmra.mxu0 %vm132_vm1, %v580_v58 }
 0x46d   :  { %v605_v60 = vpop.f32.mrf.mxu0 }
 0x46e   :  { %v606_v62 = vadd.f32 %v605_v60, %v581_v59 }
 0x470   :  { %v611_v63 = vadd.f32 %v606_v62, %v2025_v22  ;;  %v2158_v22 = vsel %vm624_vm5, %v1777_v1, %v623_v9  ;;  %v718_v9 = vperm.slane %v2037_v26, 5 }
 0x472   :  { %v613_v0 = vsel %vm132_vm1, %v611_v63, 0.0 }
 0x473   :  { %614 = vadd.xlane.f32.xlu1 %v613_v0  ;;  %v124_v0 = vld [vmem:[#allocation5 + $0x50] sm:$0xff] }
 0x474   :  { %739 = vmatpush.msra.mxu3 %v124_v0 }
 0x4a6   :  { %v608_v2 = vpop.f32.mrf.mxu0 }
 0x4a7   :  { %v609_v34 = vadd.f32 %v608_v2, %v581_v59  ;;  %v123_v2 = vld [vmem:[#allocation5 + $0x48] sm:$0xff] }
 0x4a8   :  { %740 = vmatpush.msra.mxu3 %v123_v2 }
 0x4a9   :  { %v612_v3 = vadd.f32 %v609_v34, %v2033_v25  ;;  %v122_v34 = vld [vmem:[#allocation5 + $0x40] sm:$0xff] }
 0x4aa   :  { %741 = vmatpush.msra.mxu3 %v122_v34 }
 0x4ab   :  { %v616_v4 = vsel %vm132_vm1, %v612_v3, 0.0 }
 0x4ac   :  { %617 = vadd.xlane.f32.xlu2 %v616_v4 }
 0x4c4   :  { %1705 = vrot.lane.b32.xlu2 %v1704_v42, %s1902_s7 }
 0x4e6   :  { %v615_v10 = vpop.xlane.xlu1 %614 }
 0x4e7   :  { %v626_v11 = vmul.f32 %v2158_v22, %v615_v10 }
 0x4e9   :  { %v628_v12 = vsub.f32 %v611_v63, %v626_v11 }
 0x4eb   :  { %v630_v25 = vmul.f32 %v628_v12, %v628_v12 }
 0x4ed   :  { %v632_v13 = vsel %vm132_vm1, %v630_v25, 0.0 }
 0x4ee   :  { %633 = vadd.xlane.f32.xlu0 %v632_v13 }
 0x51f   :  { %v618_v14 = vpop.xlane.xlu2 %617 }
 0x520   :  { %v627_v15 = vmul.f32 %v2158_v22, %v618_v14 }
 0x522   :  { %v629_v16 = vsub.f32 %v612_v3, %v627_v15  ;;  %v670_v3 = vperm.slane %v2037_v26, 4 }
 0x524   :  { %v631_v17 = vmul.f32 %v629_v16, %v629_v16 }
 0x526   :  { %v635_v18 = vsel %vm132_vm1, %v631_v17, 0.0 }
 0x527   :  { %636 = vadd.xlane.f32.xlu1 %v635_v18  ;;  %v1706_v23 = vpop.permute.xlu2 %1705 }
 0x528   :  { %v1707_v24 = vunpack.i.l.bf16 %v1706_v23  ;;  %v1708_v27 = vunpack.i.h.bf16 %v1706_v23 }
 0x52a   :  { %705 = vmatpush.msra.mxu1 %v1707_v24 }
 0x52c   :  { %706 = vmatpush.msra.mxu1 %v1708_v27 }
 0x540   :  { %1710 = vrot.lane.b32.xlu1 %v1709_v45, %s1902_s7 }
 0x561   :  { %v634_v19 = vpop.xlane.xlu0 %633 }
 0x562   :  { %v638_v20 = vmul.f32 %v634_v19, %v2158_v22 }
 0x564   :  { %v640_v21 = vadd.f32 1e-05, %v638_v20 }
 0x566   :  { %1778 = vrsqrt.f32 %v640_v21  ;;  %vm648_vm7 = vweird.f32 %v640_v21 }
 0x56c   :  { %v1779_v28 = vpop.eup %1778 }
 0x56d   :  { %v643_v30 = vmul.f32 %v1779_v28, %v640_v21  ;;  %vm649_vm6 = vweird.f32 %v1779_v28 }
 0x56e   :  { %vm650_vm8 = vmor %vm648_vm7, %vm649_vm6 }
 0x56f   :  { %v644_v32 = vmul.f32 %v1779_v28, %v643_v30 }
 0x571   :  { %v645_v36 = vmul.f32 0.5, %v644_v32  ;;  %v803_v32 = vld [vmem:[#allocation5 + $0x98] sm:$0xff] }
 0x573   :  { %v646_v39 = vsub.f32 1.5, %v645_v36 }
 0x575   :  { %v647_v44 = vmul.f32 %v1779_v28, %v646_v39 }
 0x577   :  { %v651_v47 = vsel %vm650_vm8, %v1779_v28, %v647_v44 }
 0x578   :  { %v662_v51 = vmul.f32 %v651_v47, %v628_v12 }
 0x57a   :  { %v665_v53 = vmul.f32 %v664_v50, %v662_v51 }
 0x57c   :  { %v668_v59 = vadd.f32 %v667_v55, %v665_v53 }
 0x59a   :  { %v637_v31 = vpop.xlane.xlu1 %636 }
 0x59b   :  { %v639_v33 = vmul.f32 %v637_v31, %v2158_v22  ;;  %v804_v31 = vld [vmem:[#allocation5 + $0xa0] sm:$0xff] }
 0x59c   :  { %837 = vmatpush.msrb.mxu2 %v804_v31 }
 0x59d   :  { %v641_v35 = vadd.f32 1e-05, %v639_v33  ;;  %v802_v33 = vld [vmem:[#allocation5 + $0x90] sm:$0xff] }
 0x59e   :  { %838 = vmatpush.msrb.mxu2 %v803_v32 }
 0x59f   :  { %1780 = vrsqrt.f32 %v641_v35  ;;  %vm658_vm10 = vweird.f32 %v641_v35 }
 0x5a0   :  { %839 = vmatpush.msrb.mxu2 %v802_v33 }
 0x5a5   :  { %v1781_v41 = vpop.eup %1780 }
 0x5a6   :  { %v653_v42 = vmul.f32 %v1781_v41, %v641_v35  ;;  %vm659_vm9 = vweird.f32 %v1781_v41  ;;  %v801_v35 = vld [vmem:[#allocation5 + $0x88] sm:$0xff] }
 0x5a7   :  { %vm660_vm11 = vmor %vm658_vm10, %vm659_vm9  ;;  %840 = vmatpush.msrb.mxu2 %v801_v35 }
 0x5a8   :  { %v654_v45 = vmul.f32 %v1781_v41, %v653_v42 }
 0x5aa   :  { %v655_v46 = vmul.f32 0.5, %v654_v45 }
 0x5ac   :  { %v656_v48 = vsub.f32 1.5, %v655_v46 }
 0x5ae   :  { %v657_v52 = vmul.f32 %v1781_v41, %v656_v48 }
 0x5b0   :  { %v661_v56 = vsel %vm660_vm11, %v1781_v41, %v657_v52 }
 0x5b1   :  { %v663_v60 = vmul.f32 %v661_v56, %v629_v16 }
 0x5b2   :  { %v1711_v54 = vpop.permute.xlu1 %1710 }
 0x5b3   :  { %v1712_v57 = vunpack.i.l.bf16 %v1711_v54  ;;  %v1713_v58 = vunpack.i.h.bf16 %v1711_v54  ;;  %v666_v62 = vmul.f32 %v664_v50, %v663_v60  ;;  %v795_v50 = vperm.slane %v2037_v26, 6 }
 0x5b4   :  { %v798_v54 = vperm.slane %v2037_v26, 7  ;;  %v2193_v26 = vld [vmem:[#allocation5 + $0x108] sm:$0xff] }
 0x5b5   :  { %707 = vmatpush.msra.mxu1 %v1712_v57  ;;  %v669_v63 = vadd.f32 %v667_v55, %v666_v62  ;;  %v818_v2 = vperm.slane %v2193_v26, 0 }
 0x5b7   :  { %708 = vmatpush.msra.mxu1 %v1713_v58 }
 0x5b8   :  { %1628 = vmatmul.msk.f32.vlgmr.msra.gmra.mxu1 %vm132_vm1, %v668_v59 }
 0x5c0   :  { %1629 = vmatmul.msk.f32.gmra.mxu1 %vm132_vm1, %v669_v63 }
 0x635   :  { %v710_v4 = vpop.f32.mrf.mxu1 }
 0x636   :  { %v711_v5 = vadd.f32 %v710_v4, %v670_v3 }
 0x638   :  { %v716_v1 = vmax.f32 %v711_v5, 0.0 }
 0x63a   :  { %1630 = vmatmul.msk.f32.vlgmr.msra.gmra.mxu3 %vm719_vm12, %v716_v1 }
 0x63d   :  { %v713_v6 = vpop.f32.mrf.mxu1 }
 0x63e   :  { %v714_v7 = vadd.f32 %v713_v6, %v670_v3 }
 0x640   :  { %v717_v8 = vmax.f32 %v714_v7, 0.0 }
 0x642   :  { %1631 = vmatmul.msk.f32.gmra.mxu3 %vm719_vm12, %v717_v8 }
 0x6bd   :  { %v743_v10 = vpop.f32.mrf.mxu3 }
 0x6be   :  { %v744_v11 = vadd.f32 %v743_v10, %v718_v9 }
 0x6c0   :  { %v749_v12 = vadd.f32 %v744_v11, %v668_v59 }
 0x6c2   :  { %v751_v25 = vsel %vm132_vm1, %v749_v12, 0.0 }
 0x6c3   :  { %752 = vadd.xlane.f32.xlu0 %v751_v25 }
 0x6c5   :  { %v746_v13 = vpop.f32.mrf.mxu3 }
 0x6c6   :  { %v747_v14 = vadd.f32 %v746_v13, %v718_v9 }
 0x6c8   :  { %v750_v15 = vadd.f32 %v747_v14, %v669_v63 }
 0x6ca   :  { %v754_v16 = vsel %vm132_vm1, %v750_v15, 0.0 }
 0x6cb   :  { %755 = vadd.xlane.f32.xlu0 %v754_v16 }
 0x736   :  { %v753_v17 = vpop.xlane.xlu0 %752 }
 0x737   :  { %v757_v18 = vmul.f32 %v753_v17, %v2158_v22 }
 0x739   :  { %v759_v19 = vsub.f32 %v749_v12, %v757_v18 }
 0x73b   :  { %v761_v20 = vmul.f32 %v759_v19, %v759_v19 }
 0x73d   :  { %v763_v21 = vsel %vm132_vm1, %v761_v20, 0.0 }
 0x73e   :  { %764 = vadd.xlane.f32.xlu2 %v763_v21  ;;  %v756_v23 = vpop.xlane.xlu0 %755 }
 0x73f   :  { %v758_v24 = vmul.f32 %v756_v23, %v2158_v22 }
 0x741   :  { %v760_v27 = vsub.f32 %v750_v15, %v758_v24 }
 0x743   :  { %v762_v28 = vmul.f32 %v760_v27, %v760_v27 }
 0x745   :  { %v766_v30 = vsel %vm132_vm1, %v762_v28, 0.0 }
 0x746   :  { %767 = vadd.xlane.f32.xlu0 %v766_v30 }
 0x7b1   :  { %v765_v36 = vpop.xlane.xlu2 %764 }
 0x7b2   :  { %v769_v37 = vmul.f32 %v765_v36, %v2158_v22 }
 0x7b4   :  { %v771_v29 = vadd.f32 1e-05, %v769_v37 }
 0x7b6   :  { %1782 = vrsqrt.f32 %v771_v29  ;;  %vm779_vm14 = vweird.f32 %v771_v29 }
 0x7b9   :  { %v768_v38 = vpop.xlane.xlu0 %767 }
 0x7ba   :  { %v770_v39 = vmul.f32 %v768_v38, %v2158_v22 }
 0x7bc   :  { %v1783_v40 = vpop.eup %1782  ;;  %v772_v41 = vadd.f32 1e-05, %v770_v39 }
 0x7bd   :  { %v774_v42 = vmul.f32 %v1783_v40, %v771_v29  ;;  %vm780_vm13 = vweird.f32 %v1783_v40 }
 0x7be   :  { %1784 = vrsqrt.f32 %v772_v41  ;;  %vm781_vm15 = vmor %vm779_vm14, %vm780_vm13  ;;  %vm789_vm5 = vweird.f32 %v772_v41 }
 0x7bf   :  { %v775_v43 = vmul.f32 %v1783_v40, %v774_v42 }
 0x7c1   :  { %v776_v44 = vmul.f32 0.5, %v775_v43 }
 0x7c3   :  { %v777_v45 = vsub.f32 1.5, %v776_v44 }
 0x7c4   :  { %v1785_v46 = vpop.eup %1784 }
 0x7c5   :  { %v778_v47 = vmul.f32 %v1783_v40, %v777_v45  ;;  %v784_v48 = vmul.f32 %v1785_v46, %v772_v41  ;;  %vm790_vm0 = vweird.f32 %v1785_v46 }
 0x7c6   :  { %vm791_vm6 = vmor %vm789_vm5, %vm790_vm0 }
 0x7c7   :  { %v782_v51 = vsel %vm781_vm15, %v1783_v40, %v778_v47  ;;  %v785_v52 = vmul.f32 %v1785_v46, %v784_v48 }
 0x7c8   :  { %v793_v53 = vmul.f32 %v782_v51, %v759_v19 }
 0x7c9   :  { %v786_v55 = vmul.f32 0.5, %v785_v52 }
 0x7ca   :  { %v796_v56 = vmul.f32 %v795_v50, %v793_v53 }
 0x7cb   :  { %v787_v57 = vsub.f32 1.5, %v786_v55 }
 0x7cc   :  { %v2185_v58 = vadd.f32 %v798_v54, %v796_v56 }
 0x7cd   :  { %v788_v59 = vmul.f32 %v1785_v46, %v787_v57 }
 0x7ce   :  { %1632 = vmatmul.msk.f32.vlgmr.msrb.gmra.mxu2 %vm132_vm1, %v2185_v58 }
 0x7cf   :  { %v792_v60 = vsel %vm791_vm6, %v1785_v46, %v788_v59 }
 0x7d0   :  { %v794_v62 = vmul.f32 %v792_v60, %v760_v27 }
 0x7d2   :  { %v797_v63 = vmul.f32 %v795_v50, %v794_v62 }
 0x7d4   :  { %v2189_v0 = vadd.f32 %v798_v54, %v797_v63 }
 0x7d6   :  { %1633 = vmatmul.msk.f32.gmra.mxu2 %vm132_vm1, %v2189_v0 }
 0x851   :  { %v842_v34 = vpop.f32.mrf.mxu2 }
 0x852   :  { %v843_v3 = vadd.f32 %v842_v34, %v818_v2 }
 0x854   :  { %852 = vrot.lane.b32.xlu1 %v843_v3, %s1902_s7  ;;  %950 = vrot.lane.b32.xlu0 %v843_v3, %s1901_s14  ;;  %v848_v4 = vmul.f32 0.35355338, %v843_v3 }
 0x856   :  { %1138 = vrot.lane.b32.xlu2 %v848_v4, %s1903_s16 }
 0x859   :  { %v845_v5 = vpop.f32.mrf.mxu2 }
 0x85a   :  { %v846_v1 = vadd.f32 %v845_v5, %v818_v2 }
 0x85c   :  { %946 = vrot.lane.b32.xlu1 %v848_v4, %s1900_s1  ;;  %v849_v6 = vmul.f32 0.35355338, %v846_v1  ;;  %v2200_v7 = vpack.i.bf16 %v843_v3, %v846_v1 }
 0x85e   :  { %948 = vrot.lane.b32.xlu0 %v849_v6, %s1900_s1 }
 0x864   :  { %952 = vrot.lane.b32.xlu1 %v846_v1, %s1901_s14 }
 0x866   :  { %1142 = vrot.lane.b32.xlu0 %v843_v3, %s1904_s17 }
 0x86c   :  { %854 = vrot.lane.b32.xlu1 %v846_v1, %s1902_s7 }
 0x86e   :  { %1046 = vrot.lane.b32.xlu0 %v843_v3, %s1905_s18 }
 0x874   :  { %1144 = vrot.lane.b32.xlu1 %v846_v1, %s1904_s17 }
 0x876   :  { %1042 = vrot.lane.b32.xlu0 %v848_v4, %s1906_s11 }
 0x87c   :  { %1048 = vrot.lane.b32.xlu1 %v846_v1, %s1905_s18 }
 0x884   :  { %1140 = vrot.lane.b32.xlu1 %v849_v6, %s1903_s16 }
 0x88c   :  { %1044 = vrot.lane.b32.xlu1 %v849_v6, %s1906_s11 }
 0x8b0   :  { %v1139_v16 = vpop.permute.xlu2 %1138 }
 0x8c6   :  { %v853_v8 = vpop.permute.xlu1 %852  ;;  %v951_v10 = vpop.permute.xlu0 %950 }
 0x8ce   :  { %v947_v9 = vpop.permute.xlu1 %946 }
 0x8d0   :  { %v949_v12 = vpop.permute.xlu0 %948 }
 0x8d6   :  { %v953_v11 = vpop.permute.xlu1 %952 }
 0x8d7   :  { %1640 = vmatpush.xpose.msk.msrb.mxu3 %vm170_vm2, %v953_v11 }
 0x8d8   :  { %v1143_v13 = vpop.permute.xlu0 %1142 }
 0x8db   :  { %1641 = vmatpush.xpose.msk.msrb.mxu3 %vm170_vm2, %v951_v10 }
 0x8de   :  { %v855_v25 = vpop.permute.xlu1 %854  ;;  %1642 = vmatmul.msk.f32.vlgmr.msrb.gmra.mxu3 %vm170_vm2, %v947_v9 }
 0x8df   :  { %1634 = vmatpush.xpose.msk.msrb.mxu0 %vm170_vm2, %v855_v25 }
 0x8e0   :  { %v1047_v15 = vpop.permute.xlu0 %1046 }
 0x8e3   :  { %1635 = vmatpush.xpose.msk.msrb.mxu0 %vm170_vm2, %v853_v8 }
 0x8e6   :  { %1636 = vmatmul.msk.f32.vlgmr.msrb.gmra.mxu0 %vm170_vm2, %v848_v4  ;;  %v1145_v14 = vpop.permute.xlu1 %1144  ;;  %1643 = vmatmul.msk.f32.gmra.mxu3 %vm170_vm2, %v949_v12 }
 0x8e7   :  { %1652 = vmatpush.xpose.msk.msra.mxu3 %vm170_vm2, %v1145_v14 }
 0x8e8   :  { %v1043_v18 = vpop.permute.xlu0 %1042 }
 0x8eb   :  { %1653 = vmatpush.xpose.msk.msra.mxu3 %vm170_vm2, %v1143_v13 }
 0x8ee   :  { %v1049_v17 = vpop.permute.xlu1 %1048  ;;  %1637 = vmatmul.msk.f32.gmra.mxu0 %vm170_vm2, %v849_v6  ;;  %1654 = vmatmul.msk.f32.vlgmr.msra.gmra.mxu3 %vm170_vm2, %v1139_v16 }
 0x8ef   :  { %1646 = vmatpush.xpose.msk.msra.mxu0 %vm170_vm2, %v1049_v17 }
 0x8f3   :  { %1647 = vmatpush.xpose.msk.msra.mxu0 %vm170_vm2, %v1047_v15 }
 0x8f6   :  { %v1141_v19 = vpop.permute.xlu1 %1140  ;;  %1648 = vmatmul.msk.f32.vlgmr.msra.gmra.mxu0 %vm170_vm2, %v1043_v18 }
 0x8f7   :  { %1655 = vmatmul.msk.f32.gmra.mxu3 %vm170_vm2, %v1141_v19 }
 0x8fe   :  { %v1045_v20 = vpop.permute.xlu1 %1044 }
 0x8ff   :  { %1649 = vmatmul.msk.f32.gmra.mxu0 %vm170_vm2, %v1045_v20 }
 0x961   :  { %v979_v21 = vpop.f32.mrf.mxu3 }
 0x962   :  { %v980_v23 = vadd.f32 %v979_v21, %v2075_v49 }
 0x963   :  { %v883_v24 = vpop.f32.mrf.mxu0 }
 0x964   :  { %v884_v27 = vadd.f32 %v883_v24, %v2075_v49  ;;  %v985_v28 = vsel %vm204_vm3, %v980_v23, -inf }
 0x965   :  { %986 = vmax.xlane.f32.xlu0 %v985_v28 }
 0x966   :  { %v889_v30 = vsel %vm204_vm3, %v884_v27, -inf }
 0x967   :  { %890 = vmax.xlane.f32.xlu2 %v889_v30 }
 0x969   :  { %v982_v31 = vpop.f32.mrf.mxu3 }
 0x96a   :  { %v983_v32 = vadd.f32 %v982_v31, %v2086_v61 }
 0x96b   :  { %v886_v33 = vpop.f32.mrf.mxu0 }
 0x96c   :  { %v887_v35 = vadd.f32 %v886_v33, %v2086_v61  ;;  %v988_v36 = vsel %vm204_vm3, %v983_v32, -inf }
 0x96d   :  { %989 = vmax.xlane.f32.xlu1 %v988_v36 }
 0x96e   :  { %v892_v37 = vsel %vm204_vm3, %v887_v35, -inf }
 0x96f   :  { %893 = vmax.xlane.f32.xlu0 %v892_v37 }
 0x971   :  { %v1171_v29 = vpop.f32.mrf.mxu3 }
 0x972   :  { %v1172_v38 = vadd.f32 %v1171_v29, %v2075_v49 }
 0x973   :  { %v1075_v39 = vpop.f32.mrf.mxu0 }
 0x974   :  { %v1076_v40 = vadd.f32 %v1075_v39, %v2075_v49  ;;  %v1177_v41 = vsel %vm204_vm3, %v1172_v38, -inf }
 0x975   :  { %1178 = vmax.xlane.f32.xlu2 %v1177_v41 }
 0x976   :  { %v1081_v42 = vsel %vm204_vm3, %v1076_v40, -inf }
 0x977   :  { %1082 = vmax.xlane.f32.xlu1 %v1081_v42 }
 0x97a   :  { %v1174_v49 = vpop.f32.mrf.mxu3 }
 0x97b   :  { %v1175_v46 = vadd.f32 %v1174_v49, %v2086_v61 }
 0x97c   :  { %v1078_v43 = vpop.f32.mrf.mxu0 }
 0x97d   :  { %v2241_v44 = vadd.f32 %v1078_v43, %v2086_v61  ;;  %v1180_v47 = vsel %vm204_vm3, %v1175_v46, -inf }
 0x97f   :  { %v1084_v45 = vsel %vm204_vm3, %v2241_v44, -inf }
 0x980   :  { %1085 = vmax.xlane.f32.xlu2 %v1084_v45 }
 0x983   :  { %1720 = vrot.lane.b32.xlu0 %v2200_v7, %s1907_s24 }
 0x998   :  { %1715 = vrot.lane.b32.xlu2 %v2200_v7, %s1909_s19 }
 0x9ad   :  { %1181 = vmax.xlane.f32.xlu0 %v1180_v47 }
 0x9d8   :  { %v987_v48 = vpop.xlane.xlu0 %986 }
 0x9d9   :  { %v991_v50 = vsub.f32 %v980_v23, %v987_v48 }
 0x9da   :  { %v891_v51 = vpop.xlane.xlu2 %890 }
 0x9db   :  { %v993_v52 = vmul.f32 1.442695, %v991_v50  ;;  %v895_v53 = vsub.f32 %v884_v27, %v891_v51 }
 0x9dd   :  { %1786 = vpow2.f32 %v993_v52  ;;  %v897_v54 = vmul.f32 1.442695, %v895_v53 }
 0x9df   :  { %1788 = vpow2.f32 %v897_v54 }
 0x9e0   :  { %v990_v55 = vpop.xlane.xlu1 %989 }
 0x9e1   :  { %v992_v62 = vsub.f32 %v983_v32, %v990_v55 }
 0x9e2   :  { %v894_v56 = vpop.xlane.xlu0 %893 }
 0x9e3   :  { %v2251_v57 = vpop.eup %1786  ;;  %v896_v59 = vsub.f32 %v887_v35, %v894_v56  ;;  %v995_v34 = vmul.f32 1.442695, %v992_v62 }
 0x9e4   :  { %v997_v60 = vsel %vm204_vm3, %v2251_v57, 0.0 }
 0x9e5   :  { %v1789_v61 = vpop.eup %1788  ;;  %v899_v63 = vmul.f32 1.442695, %v896_v59  ;;  %998 = vadd.xlane.f32.xlu1 %v997_v60 }
 0x9e6   :  { %v901_v2 = vsel %vm204_vm3, %v1789_v61, 0.0 }
 0x9e7   :  { %1790 = vpow2.f32 %v899_v63  ;;  %902 = vadd.xlane.f32.xlu0 %v901_v2 }
 0x9e8   :  { %v1179_v3 = vpop.xlane.xlu2 %1178  ;;  %1792 = vpow2.f32 %v995_v34 }
 0x9e9   :  { %v1183_v6 = vsub.f32 %v1172_v38, %v1179_v3 }
 0x9ea   :  { %v1083_v4 = vpop.xlane.xlu1 %1082 }
 0x9eb   :  { %v1087_v5 = vsub.f32 %v1076_v40, %v1083_v4  ;;  %v1185_v10 = vmul.f32 1.442695, %v1183_v6 }
 0x9ed   :  { %v1791_v1 = vpop.eup %1790  ;;  %v1089_v8 = vmul.f32 1.442695, %v1087_v5 }
 0x9ee   :  { %v904_v9 = vsel %vm204_vm3, %v1791_v1, 0.0  ;;  %v2257_v11 = vpop.eup %1792 }
 0x9ef   :  { %1794 = vpow2.f32 %v1089_v8  ;;  %905 = vadd.xlane.f32.xlu1 %v904_v9  ;;  %v1000_v16 = vsel %vm204_vm3, %v2257_v11, 0.0 }
 0x9f0   :  { %1796 = vpow2.f32 %v1185_v10 }
 0x9f3   :  { %v1086_v12 = vpop.xlane.xlu2 %1085 }
 0x9f4   :  { %v1088_v28 = vsub.f32 %v2241_v44, %v1086_v12  ;;  %v807_v12 = vld [vmem:[#allocation5 + $0xb8] sm:$0xff] }
 0x9f5   :  { %v2259_v25 = vpop.eup %1794  ;;  %v1721_v13 = vpop.permute.xlu0 %1720 }
 0x9f6   :  { %v1722_v14 = vunpack.i.l.bf16 %v1721_v13  ;;  %v1093_v15 = vsel %vm204_vm3, %v2259_v25, 0.0  ;;  %v1723_v17 = vunpack.i.h.bf16 %v1721_v13  ;;  %v1797_v18 = vpop.eup %1796  ;;  %v1091_v31 = vmul.f32 1.442695, %v1088_v28  ;;  %v806_v13 = vld [vmem:[#allocation5 + $0xb0] sm:$0xff] }
 0x9f7   :  { %1094 = vadd.xlane.f32.xlu2 %v1093_v15  ;;  %1001 = vadd.xlane.f32.xlu1 %v1000_v16  ;;  %v1189_v23 = vsel %vm204_vm3, %v1797_v18, 0.0 }
 0x9f8   :  { %937 = vmatpush.msrb.mxu1 %v1722_v14  ;;  %v805_v14 = vld [vmem:[#allocation5 + $0xa8] sm:$0xff] }
 0x9f9   :  { %v1739_v15 = vpack.i.bf16 %v805_v14, %v806_v13 }
 0x9fa   :  { %938 = vmatpush.msrb.mxu1 %v1723_v17 }
 0x9fb   :  { %1725 = vrot.lane.b32.xlu0 %v2200_v7, %s1908_s0  ;;  %v1716_v19 = vpop.permute.xlu2 %1715 }
 0x9fc   :  { %v1717_v20 = vunpack.i.l.bf16 %v1716_v19  ;;  %v1718_v21 = vunpack.i.h.bf16 %v1716_v19 }
 0x9fe   :  { %1033 = vmatpush.msra.mxu2 %v1717_v20 }
 0x9ff   :  { %1190 = vadd.xlane.f32.xlu1 %v1189_v23 }
 0xa00   :  { %1034 = vmatpush.msra.mxu2 %v1718_v21 }
 0xa03   :  { %1730 = vrot.lane.b32.xlu0 %v2200_v7, %s1910_s26 }
 0xa20   :  { %v1182_v24 = vpop.xlane.xlu0 %1181 }
 0xa21   :  { %v1184_v27 = vsub.f32 %v1175_v46, %v1182_v24 }
 0xa23   :  { %v1187_v30 = vmul.f32 1.442695, %v1184_v27 }
 0xa25   :  { %1798 = vpow2.f32 %v1187_v30 }
 0xa26   :  { %1800 = vpow2.f32 %v1091_v31 }
 0xa2b   :  { %v1799_v32 = vpop.eup %1798 }
 0xa2c   :  { %v1192_v33 = vsel %vm204_vm3, %v1799_v32, 0.0  ;;  %v1801_v35 = vpop.eup %1800 }
 0xa2d   :  { %1193 = vadd.xlane.f32.xlu1 %v1192_v33  ;;  %v1096_v36 = vsel %vm204_vm3, %v1801_v35, 0.0 }
 0xa35   :  { %1097 = vadd.xlane.f32.xlu1 %v1096_v36 }
 0xa58   :  { %v999_v37 = vpop.xlane.xlu1 %998 }
 0xa59   :  { %1802 = vrcp.f32 %v999_v37 }
 0xa5a   :  { %v903_v29 = vpop.xlane.xlu0 %902 }
 0xa5b   :  { %1804 = vrcp.f32 %v903_v29 }
 0xa5f   :  { %v1803_v7 = vpop.eup %1802 }
 0xa60   :  { %v1005_v38 = vmul.f32 %v1803_v7, %v2251_v57 }
 0xa61   :  { %v1805_v39 = vpop.eup %1804 }
 0xa62   :  { %v909_v40 = vmul.f32 %v1805_v39, %v1789_v61  ;;  %1644 = vmatmul.msk.f32.vlgmr.msra.gmra.mxu2 %vm204_vm3, %v1005_v38  ;;  %v906_v41 = vpop.xlane.xlu1 %905 }
 0xa63   :  { %1806 = vrcp.f32 %v906_v41 }
 0xa64   :  { %1638 = vmatmul.msk.f32.vlgmr.msrb.gmra.mxu1 %vm204_vm3, %v909_v40 }
 0xa69   :  { %v1807_v42 = vpop.eup %1806 }
 0xa6a   :  { %v1002_v43 = vpop.xlane.xlu1 %1001  ;;  %v910_v44 = vmul.f32 %v1807_v42, %v1791_v1  ;;  %v1095_v45 = vpop.xlane.xlu2 %1094 }
 0xa6b   :  { %1808 = vrcp.f32 %v1002_v43 }
 0xa6c   :  { %1639 = vmatmul.msk.f32.gmra.mxu1 %vm204_vm3, %v910_v44  ;;  %1810 = vrcp.f32 %v1095_v45 }
 0xa6d   :  { %v1726_v49 = vpop.permute.xlu0 %1725 }
 0xa6e   :  { %v1727_v46 = vunpack.i.l.bf16 %v1726_v49  ;;  %v1728_v47 = vunpack.i.h.bf16 %v1726_v49 }
 0xa70   :  { %1225 = vmatpush.msrb.mxu2 %v1727_v46 }
 0xa71   :  { %v1809_v48 = vpop.eup %1808 }
 0xa72   :  { %v1191_v50 = vpop.xlane.xlu1 %1190  ;;  %1226 = vmatpush.msrb.mxu2 %v1728_v47  ;;  %v1006_v51 = vmul.f32 %v1809_v48, %v2257_v11  ;;  %v1811_v53 = vpop.eup %1810  ;;  %v808_v11 = vld [vmem:[#allocation5 + $0xc0] sm:$0xff] }
 0xa73   :  { %1812 = vrcp.f32 %v1191_v50  ;;  %v1101_v57 = vmul.f32 %v1811_v53, %v2259_v25  ;;  %1283 = vmatpush.msrb.mxu0 %v808_v11  ;;  %v1734_v25 = vpack.i.bf16 %v807_v12, %v808_v11 }
 0xa74   :  { %1645 = vmatmul.msk.f32.gmra.mxu2 %vm204_vm3, %v1006_v51 }
 0xa75   :  { %v1731_v52 = vpop.permute.xlu0 %1730  ;;  %1284 = vmatpush.msrb.mxu0 %v807_v12  ;;  %v1340_v12 = vperm.slane %v2193_v26, 2 }
 0xa76   :  { %v1732_v54 = vunpack.i.l.bf16 %v1731_v52  ;;  %v1733_v55 = vunpack.i.h.bf16 %v1731_v52 }
 0xa77   :  { %1285 = vmatpush.msrb.mxu0 %v806_v13 }
 0xa78   :  { %1129 = vmatpush.msra.mxu1 %v1732_v54 }
 0xa79   :  { %v1813_v56 = vpop.eup %1812  ;;  %1286 = vmatpush.msrb.mxu0 %v805_v14 }
 0xa7a   :  { %v1197_v59 = vmul.f32 %v1813_v56, %v1797_v18  ;;  %1130 = vmatpush.msra.mxu1 %v1733_v55 }
 0xa7b   :  { %1650 = vmatmul.msk.f32.vlgmr.msra.gmra.mxu1 %vm204_vm3, %v1101_v57 }
 0xa7c   :  { %1656 = vmatmul.msk.f32.vlgmr.msrb.gmra.mxu2 %vm204_vm3, %v1197_v59 }
 0xaa0   :  { %v1194_v60 = vpop.xlane.xlu1 %1193 }
 0xaa1   :  { %1814 = vrcp.f32 %v1194_v60 }
 0xaa7   :  { %v1815_v61 = vpop.eup %1814 }
 0xaa8   :  { %v1098_v62 = vpop.xlane.xlu1 %1097  ;;  %v1198_v63 = vmul.f32 %v1815_v61, %v1799_v32  ;;  %v1264_v32 = vperm.slane %v2193_v26, 1 }
 0xaa9   :  { %1816 = vrcp.f32 %v1098_v62  ;;  %v816_v62 = vld [vmem:[#allocation5 + $0x100] sm:$0xff] }
 0xaaa   :  { %1657 = vmatmul.msk.f32.gmra.mxu2 %vm204_vm3, %v1198_v63  ;;  %v815_v63 = vld [vmem:[#allocation5 + $0xf8] sm:$0xff]  ;;  %1409 = vmatpush.msrb.mxu3 %v816_v62 }
 0xaac   :  { %1410 = vmatpush.msrb.mxu3 %v815_v63 }
 0xaaf   :  { %v1817_v2 = vpop.eup %1816 }
 0xab0   :  { %v1102_v34 = vmul.f32 %v1817_v2, %v1801_v35  ;;  %v814_v2 = vld [vmem:[#allocation5 + $0xf0] sm:$0xff] }
 0xab1   :  { %1411 = vmatpush.msrb.mxu3 %v814_v2 }
 0xab2   :  { %1651 = vmatmul.msk.f32.gmra.mxu1 %vm204_vm3, %v1102_v34 }
 0xae1   :  { %v940_v4 = vpop.f32.mrf.mxu1 }
 0xae5   :  { %v1036_v3 = vpop.f32.mrf.mxu2 }
 0xae6   :  { %1236 = vrot.lane.b32.xlu0 %v1036_v3, %s1899_s25  ;;  %v813_v3 = vld [vmem:[#allocation5 + $0xe8] sm:$0xff] }
 0xae7   :  { %1412 = vmatpush.msrb.mxu3 %v813_v3 }
 0xae9   :  { %v943_v5 = vpop.f32.mrf.mxu1 }
 0xaf7   :  { %v1039_v1 = vpop.f32.mrf.mxu2 }
 0xaf8   :  { %v1132_v6 = vpop.f32.mrf.mxu1  ;;  %1238 = vrot.lane.b32.xlu0 %v1039_v1, %s1899_s25  ;;  %v812_v1 = vld [vmem:[#allocation5 + $0xe0] sm:$0xff] }
 0xaf9   :  { %1244 = vrot.lane.b32.xlu1 %v1132_v6, %s1912_s2  ;;  %1413 = vmatpush.msrb.mxu3 %v812_v1 }
 0xaff   :  { %v1228_v8 = vpop.f32.mrf.mxu2 }
 0xb00   :  { %1252 = vrot.lane.b32.xlu0 %v1228_v8, %s1911_s28 }
 0xb2d   :  { %v1231_v9 = vpop.f32.mrf.mxu2 }
 0xb2e   :  { %1254 = vrot.lane.b32.xlu0 %v1231_v9, %s1911_s28 }
 0xb2f   :  { %v1135_v10 = vpop.f32.mrf.mxu1 }
 0xb30   :  { %1246 = vrot.lane.b32.xlu2 %v1135_v10, %s1912_s2 }
 0xb58   :  { %v1237_v16 = vpop.permute.xlu0 %1236 }
 0xb59   :  { %v1258_v19 = vsel %vm170_vm2, %v940_v4, %v1237_v16  ;;  %v1343_v16 = vperm.slane %v2193_v26, 3 }
 0xb6a   :  { %v1239_v17 = vpop.permute.xlu0 %1238 }
 0xb6b   :  { %v1245_v18 = vpop.permute.xlu1 %1244  ;;  %v1259_v27 = vsel %vm170_vm2, %v943_v5, %v1239_v17 }
 0xb6c   :  { %v1260_v20 = vsel %vm204_vm3, %v1258_v19, %v1245_v18 }
 0xb72   :  { %v1253_v21 = vpop.permute.xlu0 %1252 }
 0xb73   :  { %v1262_v23 = vsel %vm578_vm4, %v1260_v20, %v1253_v21 }
 0xb74   :  { %1658 = vmatmul.msk.f32.vlgmr.msrb.gmra.mxu0 %vm132_vm1, %v1262_v23 }
 0xb8a   :  { %v1247_v24 = vpop.permute.xlu2 %1246 }
 0xb8b   :  { %v1261_v28 = vsel %vm204_vm3, %v1259_v27, %v1247_v24  ;;  %v811_v27 = vld [vmem:[#allocation5 + $0xd8] sm:$0xff] }
 0xb8c   :  { %1414 = vmatpush.msrb.mxu3 %v811_v27 }
 0xba0   :  { %v1255_v30 = vpop.permute.xlu0 %1254 }
 0xba1   :  { %v1263_v31 = vsel %vm578_vm4, %v1261_v28, %v1255_v30  ;;  %v810_v28 = vld [vmem:[#allocation5 + $0xd0] sm:$0xff]  ;;  %v809_v30 = vld [vmem:[#allocation5 + $0xc8] sm:$0xff] }
 0xba2   :  { %1659 = vmatmul.msk.f32.gmra.mxu0 %vm132_vm1, %v1263_v31  ;;  %1415 = vmatpush.msrb.mxu3 %v810_v28  ;;  %v1346_v31 = vperm.slane %v2193_v26, 4 }
 0xba4   :  { %1416 = vmatpush.msrb.mxu3 %v809_v30 }
 0xbf1   :  { %v1288_v33 = vpop.f32.mrf.mxu0 }
 0xbf2   :  { %v1289_v35 = vadd.f32 %v1288_v33, %v1264_v32 }
 0xbf4   :  { %v1294_v36 = vadd.f32 %v1289_v35, %v2185_v58 }
 0xbf6   :  { %v1296_v37 = vsel %vm132_vm1, %v1294_v36, 0.0 }
 0xbf7   :  { %1297 = vadd.xlane.f32.xlu1 %v1296_v37 }
 0xc1f   :  { %v1291_v29 = vpop.f32.mrf.mxu0 }
 0xc20   :  { %v1292_v7 = vadd.f32 %v1291_v29, %v1264_v32 }
 0xc22   :  { %v1295_v38 = vadd.f32 %v1292_v7, %v2189_v0  ;;  %v1394_v7 = vperm.slane %v2193_v26, 5 }
 0xc24   :  { %v1299_v39 = vsel %vm132_vm1, %v1295_v38, 0.0 }
 0xc25   :  { %1300 = vadd.xlane.f32.xlu0 %v1299_v39 }
 0xc39   :  { %1735 = vrot.lane.b32.xlu0 %v1734_v25, %s1902_s7 }
 0xc6a   :  { %v1298_v40 = vpop.xlane.xlu1 %1297 }
 0xc6b   :  { %v1302_v41 = vmul.f32 %v1298_v40, %v2158_v22 }
 0xc6d   :  { %v1304_v42 = vsub.f32 %v1294_v36, %v1302_v41 }
 0xc6f   :  { %v1306_v43 = vmul.f32 %v1304_v42, %v1304_v42 }
 0xc71   :  { %v1308_v44 = vsel %vm132_vm1, %v1306_v43, 0.0 }
 0xc72   :  { %1309 = vadd.xlane.f32.xlu2 %v1308_v44 }
 0xc98   :  { %v1301_v58 = vpop.xlane.xlu0 %1300 }
 0xc99   :  { %v1303_v45 = vmul.f32 %v1301_v58, %v2158_v22 }
 0xc9b   :  { %v1305_v49 = vsub.f32 %v1295_v38, %v1303_v45 }
 0xc9d   :  { %v1307_v46 = vmul.f32 %v1305_v49, %v1305_v49 }
 0xc9f   :  { %v1311_v0 = vsel %vm132_vm1, %v1307_v46, 0.0 }
 0xca0   :  { %1312 = vadd.xlane.f32.xlu1 %v1311_v0 }
 0xcab   :  { %v1736_v51 = vpop.permute.xlu0 %1735 }
 0xcac   :  { %v1737_v52 = vunpack.i.l.bf16 %v1736_v51  ;;  %v1738_v53 = vunpack.i.h.bf16 %v1736_v51 }
 0xcae   :  { %1381 = vmatpush.msrb.mxu1 %v1737_v52 }
 0xcb0   :  { %1382 = vmatpush.msrb.mxu1 %v1738_v53 }
 0xcb9   :  { %1740 = vrot.lane.b32.xlu1 %v1739_v15, %s1902_s7 }
 0xce5   :  { %v1310_v47 = vpop.xlane.xlu2 %1309 }
 0xce6   :  { %v1314_v48 = vmul.f32 %v1310_v47, %v2158_v22 }
 0xce8   :  { %v1316_v50 = vadd.f32 1e-05, %v1314_v48 }
 0xcea   :  { %1818 = vrsqrt.f32 %v1316_v50  ;;  %vm1324_vm4 = vweird.f32 %v1316_v50 }
 0xcf0   :  { %v1819_v54 = vpop.eup %1818 }
 0xcf1   :  { %v1319_v55 = vmul.f32 %v1819_v54, %v1316_v50  ;;  %vm1325_vm2 = vweird.f32 %v1819_v54 }
 0xcf2   :  { %vm1326_vm7 = vmor %vm1324_vm4, %vm1325_vm2 }
 0xcf3   :  { %v1320_v57 = vmul.f32 %v1819_v54, %v1319_v55 }
 0xcf5   :  { %v1321_v61 = vmul.f32 0.5, %v1320_v57 }
 0xcf7   :  { %v1322_v34 = vsub.f32 1.5, %v1321_v61 }
 0xcf9   :  { %v1323_v6 = vmul.f32 %v1819_v54, %v1322_v34 }
 0xcfb   :  { %v1327_v10 = vsel %vm1326_vm7, %v1819_v54, %v1323_v6 }
 0xcfc   :  { %v1338_v25 = vmul.f32 %v1327_v10, %v1304_v42 }
 0xcfe   :  { %v1341_v14 = vmul.f32 %v1340_v12, %v1338_v25  ;;  %v1470_v25 = vperm.slane %v2193_v26, 6 }
 0xd00   :  { %v1344_v20 = vadd.f32 %v1343_v16, %v1341_v14  ;;  %v1473_v14 = vperm.slane %v2193_v26, 7 }
 0xd13   :  { %v1313_v56 = vpop.xlane.xlu1 %1312 }
 0xd14   :  { %v1315_v59 = vmul.f32 %v1313_v56, %v2158_v22 }
 0xd16   :  { %v1317_v60 = vadd.f32 1e-05, %v1315_v59 }
 0xd18   :  { %1820 = vrsqrt.f32 %v1317_v60  ;;  %vm1334_vm9 = vweird.f32 %v1317_v60 }
 0xd1e   :  { %v1821_v4 = vpop.eup %1820 }
 0xd1f   :  { %v1329_v5 = vmul.f32 %v1821_v4, %v1317_v60  ;;  %vm1335_vm8 = vweird.f32 %v1821_v4 }
 0xd20   :  { %vm1336_vm10 = vmor %vm1334_vm9, %vm1335_vm8  ;;  %vm1550_vm8 = vcmask 254976  }
 0xd21   :  { %v1330_v8 = vmul.f32 %v1821_v4, %v1329_v5 }
 0xd23   :  { %v1331_v9 = vmul.f32 0.5, %v1330_v8 }
 0xd25   :  { %v1332_v11 = vsub.f32 1.5, %v1331_v9 }
 0xd27   :  { %v1333_v13 = vmul.f32 %v1821_v4, %v1332_v11 }
 0xd29   :  { %v1337_v17 = vsel %vm1336_vm10, %v1821_v4, %v1333_v13 }
 0xd2a   :  { %v1339_v21 = vmul.f32 %v1337_v17, %v1305_v49 }
 0xd2b   :  { %v1741_v15 = vpop.permute.xlu1 %1740 }
 0xd2c   :  { %v1742_v18 = vunpack.i.l.bf16 %v1741_v15  ;;  %v1743_v19 = vunpack.i.h.bf16 %v1741_v15  ;;  %v1342_v23 = vmul.f32 %v1340_v12, %v1339_v21 }
 0xd2e   :  { %1383 = vmatpush.msrb.mxu1 %v1742_v18  ;;  %v1345_v24 = vadd.f32 %v1343_v16, %v1342_v23 }
 0xd30   :  { %1384 = vmatpush.msrb.mxu1 %v1743_v19 }
 0xd31   :  { %1660 = vmatmul.msk.f32.vlgmr.msrb.gmra.mxu1 %vm132_vm1, %v1344_v20 }
 0xd39   :  { %1661 = vmatmul.msk.f32.gmra.mxu1 %vm132_vm1, %v1345_v24 }
 0xdae   :  { %v1386_v32 = vpop.f32.mrf.mxu1 }
 0xdaf   :  { %v1387_v33 = vadd.f32 %v1386_v32, %v1346_v31 }
 0xdb1   :  { %v1392_v35 = vmax.f32 %v1387_v33, 0.0 }
 0xdb3   :  { %1662 = vmatmul.msk.f32.vlgmr.msrb.gmra.mxu3 %vm719_vm12, %v1392_v35 }
 0xdb6   :  { %v1389_v36 = vpop.f32.mrf.mxu1 }
 0xdb7   :  { %v1390_v37 = vadd.f32 %v1389_v36, %v1346_v31 }
 0xdb9   :  { %v1393_v29 = vmax.f32 %v1390_v37, 0.0 }
 0xdbb   :  { %1663 = vmatmul.msk.f32.gmra.mxu3 %vm719_vm12, %v1393_v29 }
 0xe36   :  { %v1418_v38 = vpop.f32.mrf.mxu3 }
 0xe37   :  { %v1419_v39 = vadd.f32 %v1418_v38, %v1394_v7 }
 0xe39   :  { %v1424_v40 = vadd.f32 %v1419_v39, %v1344_v20 }
 0xe3b   :  { %v1426_v41 = vsel %vm132_vm1, %v1424_v40, 0.0 }
 0xe3c   :  { %1427 = vadd.xlane.f32.xlu0 %v1426_v41 }
 0xe3e   :  { %v1421_v42 = vpop.f32.mrf.mxu3 }
 0xe3f   :  { %v1422_v43 = vadd.f32 %v1421_v42, %v1394_v7 }
 0xe41   :  { %v1425_v44 = vadd.f32 %v1422_v43, %v1345_v24 }
 0xe43   :  { %v1429_v58 = vsel %vm132_vm1, %v1425_v44, 0.0 }
 0xe44   :  { %1430 = vadd.xlane.f32.xlu2 %v1429_v58 }
 0xeaf   :  { %v1428_v45 = vpop.xlane.xlu0 %1427 }
 0xeb0   :  { %v1432_v49 = vmul.f32 %v1428_v45, %v2158_v22 }
 0xeb2   :  { %v1434_v46 = vsub.f32 %v1424_v40, %v1432_v49 }
 0xeb4   :  { %v1436_v0 = vmul.f32 %v1434_v46, %v1434_v46 }
 0xeb6   :  { %v1438_v47 = vsel %vm132_vm1, %v1436_v0, 0.0 }
 0xeb7   :  { %v1431_v48 = vpop.xlane.xlu2 %1430  ;;  %1439 = vadd.xlane.f32.xlu1 %v1438_v47 }
 0xeb8   :  { %v1433_v50 = vmul.f32 %v1431_v48, %v2158_v22 }
 0xeba   :  { %v1435_v51 = vsub.f32 %v1425_v44, %v1433_v50  ;;  %v1476_v44 = vld [vmem:[#allocation5 + $0x110] sm:$0xff] }
 0xebb   :  { %v1524_v50 = vperm.slane %v1476_v44, 1 }
 0xebc   :  { %v1437_v52 = vmul.f32 %v1435_v51, %v1435_v51 }
 0xebe   :  { %v1441_v53 = vsel %vm132_vm1, %v1437_v52, 0.0 }
 0xebf   :  { %1442 = vadd.xlane.f32.xlu2 %v1441_v53 }
 0xf2a   :  { %v1440_v54 = vpop.xlane.xlu1 %1439 }
 0xf2b   :  { %v1444_v55 = vmul.f32 %v1440_v54, %v2158_v22 }
 0xf2d   :  { %v1446_v56 = vadd.f32 1e-05, %v1444_v55 }
 0xf2f   :  { %1822 = vrsqrt.f32 %v1446_v56  ;;  %vm1454_vm13 = vweird.f32 %v1446_v56 }
 0xf32   :  { %v1443_v57 = vpop.xlane.xlu2 %1442 }
 0xf33   :  { %v1445_v59 = vmul.f32 %v1443_v57, %v2158_v22 }
 0xf35   :  { %v1823_v60 = vpop.eup %1822  ;;  %v1447_v61 = vadd.f32 1e-05, %v1445_v59 }
 0xf36   :  { %v1449_v62 = vmul.f32 %v1823_v60, %v1446_v56  ;;  %vm1455_vm11 = vweird.f32 %v1823_v60 }
 0xf37   :  { %1824 = vrsqrt.f32 %v1447_v61  ;;  %vm1456_vm14 = vmor %vm1454_vm13, %vm1455_vm11  ;;  %vm1464_vm15 = vweird.f32 %v1447_v61 }
 0xf38   :  { %v1450_v63 = vmul.f32 %v1823_v60, %v1449_v62 }
 0xf3a   :  { %v1451_v2 = vmul.f32 0.5, %v1450_v63 }
 0xf3c   :  { %v1452_v4 = vsub.f32 1.5, %v1451_v2 }
 0xf3d   :  { %v1825_v34 = vpop.eup %1824 }
 0xf3e   :  { %v1459_v3 = vmul.f32 %v1825_v34, %v1447_v61  ;;  %v1453_v6 = vmul.f32 %v1823_v60, %v1452_v4  ;;  %vm1465_vm12 = vweird.f32 %v1825_v34 }
 0xf3f   :  { %vm1466_vm0 = vmor %vm1464_vm15, %vm1465_vm12 }
 0xf40   :  { %v1460_v5 = vmul.f32 %v1825_v34, %v1459_v3  ;;  %v1457_v11 = vsel %vm1456_vm14, %v1823_v60, %v1453_v6  ;;  %v109_v60 = vld [vmem:[%s2347_s3 + $0x20] sm:$0x3] }
 0xf41   :  { %v1468_v15 = vmul.f32 %v1457_v11, %v1434_v46  ;;  %v1521_v46 = vperm.slane %v1476_v44, 0 }
 0xf42   :  { %v1461_v1 = vmul.f32 0.5, %v1460_v5 }
 0xf43   :  { %v1471_v18 = vmul.f32 %v1470_v25, %v1468_v15 }
 0xf44   :  { %v1462_v8 = vsub.f32 1.5, %v1461_v1 }
 0xf45   :  { %v1474_v19 = vadd.f32 %v1473_v14, %v1471_v18 }
 0xf46   :  { %v1463_v9 = vmul.f32 %v1825_v34, %v1462_v8 }
 0xf47   :  { %v1477_v20 = vsel %vm132_vm1, %v1474_v19, 0.0 }
 0xf48   :  { %v1467_v10 = vsel %vm1466_vm0, %v1825_v34, %v1463_v9 }
 0xf49   :  { %v1469_v12 = vmul.f32 %v1467_v10, %v1435_v51 }
 0xf4b   :  { %v1472_v13 = vmul.f32 %v1470_v25, %v1469_v12 }
 0xf4d   :  { %v1475_v16 = vadd.f32 %v1473_v14, %v1472_v13 }
 0xf4f   :  { %v1480_v17 = vsel %vm132_vm1, %v1475_v16, 0.0 }
 0xf50   :  { %1481 = vadd.xlane.f32.xlu2 %v1480_v17 }
 0xf58   :  { %1478 = vadd.xlane.f32.xlu2 %v1477_v20 }
 0xfc3   :  { %v1482_v21 = vpop.xlane.xlu2 %1481 }
 0xfc4   :  { %v1484_v23 = vmul.f32 %v1482_v21, %v2158_v22 }
 0xfc6   :  { %v1486_v24 = vsub.f32 %v1475_v16, %v1484_v23 }
 0xfc8   :  { %v1488_v27 = vmul.f32 %v1486_v24, %v1486_v24 }
 0xfca   :  { %v1492_v28 = vsel %vm132_vm1, %v1488_v27, 0.0 }
 0xfcb   :  { %1493 = vadd.xlane.f32.xlu2 %v1492_v28  ;;  %v1479_v30 = vpop.xlane.xlu2 %1478 }
 0xfcc   :  { %v1483_v26 = vmul.f32 %v1479_v30, %v2158_v22 }
 0xfce   :  { %v1485_v31 = vsub.f32 %v1474_v19, %v1483_v26 }
 0xfd0   :  { %v1487_v32 = vmul.f32 %v1485_v31, %v1485_v31 }
 0xfd2   :  { %v1489_v33 = vsel %vm132_vm1, %v1487_v32, 0.0 }
 0xfd3   :  { %1490 = vadd.xlane.f32.xlu2 %v1489_v33 }
0x103e   :  { %v1494_v35 = vpop.xlane.xlu2 %1493 }
0x103f   :  { %v1496_v36 = vmul.f32 %v1494_v35, %v2158_v22 }
0x1041   :  { %v1498_v37 = vadd.f32 1e-05, %v1496_v36 }
0x1043   :  { %1826 = vrsqrt.f32 %v1498_v37  ;;  %vm1515_vm1 = vweird.f32 %v1498_v37 }
0x1046   :  { %v1491_v29 = vpop.xlane.xlu2 %1490 }
0x1047   :  { %v1495_v7 = vmul.f32 %v1491_v29, %v2158_v22 }
0x1049   :  { %v1827_v38 = vpop.eup %1826  ;;  %v1497_v39 = vadd.f32 1e-05, %v1495_v7 }
0x104a   :  { %v1510_v40 = vmul.f32 %v1827_v38, %v1498_v37  ;;  %vm1516_vm5 = vweird.f32 %v1827_v38 }
0x104b   :  { %1828 = vrsqrt.f32 %v1497_v39  ;;  %vm1517_vm6 = vmor %vm1515_vm1, %vm1516_vm5  ;;  %vm1505_vm4 = vweird.f32 %v1497_v39 }
0x104c   :  { %v1511_v41 = vmul.f32 %v1827_v38, %v1510_v40 }
0x104e   :  { %v1512_v42 = vmul.f32 0.5, %v1511_v41 }
0x1050   :  { %v1513_v43 = vsub.f32 1.5, %v1512_v42 }
0x1051   :  { %v1829_v58 = vpop.eup %1828 }
0x1052   :  { %v1514_v45 = vmul.f32 %v1827_v38, %v1513_v43  ;;  %v1500_v49 = vmul.f32 %v1829_v58, %v1497_v39  ;;  %vm1506_vm2 = vweird.f32 %v1829_v58 }
0x1053   :  { %vm1507_vm7 = vmor %vm1505_vm4, %vm1506_vm2 }
0x1054   :  { %v1518_v0 = vsel %vm1517_vm6, %v1827_v38, %v1514_v45  ;;  %v1501_v47 = vmul.f32 %v1829_v58, %v1500_v49 }
0x1055   :  { %v1520_v48 = vmul.f32 %v1518_v0, %v1486_v24 }
0x1056   :  { %v1502_v22 = vmul.f32 0.5, %v1501_v47 }
0x1057   :  { %v1523_v51 = vmul.f32 %v1521_v46, %v1520_v48 }
0x1058   :  { %v1503_v52 = vsub.f32 1.5, %v1502_v22 }
0x1059   :  { %v1526_v53 = vadd.f32 %v1524_v50, %v1523_v51 }
0x105a   :  { %v1504_v54 = vmul.f32 %v1829_v58, %v1503_v52 }
0x105b   :  { %1544 = vmatpush.msra.mxu2 %v1526_v53 }
0x105c   :  { %v1508_v55 = vsel %vm1507_vm7, %v1829_v58, %v1504_v54 }
0x105d   :  { %v1519_v56 = vmul.f32 %v1508_v55, %v1485_v31 }
0x105f   :  { %v1522_v57 = vmul.f32 %v1521_v46, %v1519_v56 }
0x1061   :  { %v1525_v59 = vadd.f32 %v1524_v50, %v1522_v57 }
0x1063   :  { %1545 = vmatpush.msra.mxu2 %v1525_v59 }
0x1064   :  { %1664 = vmatmul.msk.f32.vlgmr.msra.gmra.mxu2 %vm204_vm3, %v109_v60 }
0x10e7   :  { %v1547_v61 = vpop.f32.mrf.mxu2 }
0x10e8   :  { %1551 = vst.msk [vmem:[#allocation8] sm:$0x3] %vm1550_vm8, %v1547_v61 }
0x10e9   :  { %1562 = dma.vmem_to_hbm [thread:$0]  %s1558_s29, 32, %s1560_s9, [#allocation7]  }
0x10ea   :  { %1894 = dma.done.wait [#allocation7], 32  }
0x10eb   :  { %1895 = vsyncadd [#allocation7], 4294967264 }
0x10ec   :  { %1567 = vsyncpa [#allocation6], 1 }
0x10ed   :  { %1568 = vsyncpa [#allocation7], 1 }

</bundles_post_ra>
